<compile_context>
chip_gen: v7x
topology: tpu7x:2x2x1
jax: 0.10.0
libtpu: 0.0.40
codegen_flags: <defaults>
</compile_context>

<pallas_src>
import functools

import jax
import jax.numpy as jnp
from jax import lax
from jax.experimental import pallas as pl
from jax.experimental.pallas import tpu as pltpu

# ----------------------------- config (opt.*) --------------------------------
N_CLASSES = 2
BATCH_SIZE = 8          # native sublane count
IMG_SIZE = 16
PROJ_DIM = 32
LATENT_DIM = 8          # z is sampled but never used by the torch forward (dead code)
N_UNROLL = 3            # opt.n_unroll_blocks
NB_BATCH = 3
LR = 0.001
TAU = 1.0               # the tau-decay branch in the torch source is a dead string literal

GEN_IN = 2 * PROJ_DIM + N_CLASSES              # concat(w_t, w_t - w_star) ++ onehot
GEN_OUT = IMG_SIZE * IMG_SIZE                  # generator emits a 1xHxW image, flattened
DISC_IN = (1 + N_CLASSES) * IMG_SIZE * IMG_SIZE
SLAB_ROWS = 2 * PROJ_DIM + N_CLASSES + 1       # dgaT | dgbT | dgcT | dgbias  = 67 rows

_VMEM = functools.partial(pl.BlockSpec, memory_space=pltpu.MemorySpace.VMEM)


# ----------------------------- shared math helpers ----------------------------
def _sigmoid(z):
    return 1.0 / (1.0 + jnp.exp(-z))


def _bce(p, t):
    # torch.nn.BCELoss clamps each log term at -100 (reference / debug path only)
    return -(t * jnp.maximum(jnp.log(p), -100.0)
             + (1.0 - t) * jnp.maximum(jnp.log(1.0 - p), -100.0))


# ----------------------------- fused Pallas kernel ----------------------------
def _fused_unrolled_kernel(
        # inputs
        vecs_ref, rows_ref, gWab_ref, gWc_ref, gbe_ref, proj_ref, projT_ref, dWs_ref,
        # outputs
        slab_ref, samples_ref, misc_ref):
    f32 = jnp.float32
    B = BATCH_SIZE
    P = PROJ_DIM

    w0 = vecs_ref[0:1, :]                        # (1, P)  student_w0
    w_star = vecs_ref[1:2, :]                    # (1, P)
    tea_w = vecs_ref[2:3, :]                     # (1, P)
    gWab = gWab_ref[...]                         # (P, GEN_OUT) = (gen_W[:, :P] + gen_W[:, P:2P]).T
    gWc0 = gWc_ref[0:1, :]                       # (1, GEN_OUT) class-0 column of gen_W
    gWc1 = gWc_ref[1:2, :]                       # (1, GEN_OUT) class-1 column of gen_W
    gb_eff = gbe_ref[...]                        # (1, GEN_OUT) = gen_b - w_star @ gen_W[:, P:2P].T
    proj = proj_ref[...]                         # (GEN_OUT, P)
    projT = projT_ref[...]                       # (P, GEN_OUT)
    dWs = dWs_ref[...]                           # (1, GEN_OUT) disc_W sample-channel cols

    def sigmoid(z):
        # exp + approx reciprocal both ride the (otherwise idle) EUP slot
        return pl.reciprocal(1.0 + jnp.exp(-z), approx=True)

    def bce_logits_mean(z, y):
        # mean_b [ softplus(z) - y*z ]  (== BCE(sigmoid(z), y), clamp is a no-op at these scales)
        v = jnp.maximum(z, 0.0) - y * z + jnp.log(1.0 + jnp.exp(-jnp.abs(z)))
        return jnp.mean(v, keepdims=True)                                # (1, 1)

    def gen_forward(w_t, cls_col):
        # tanh(gin @ gen_W.T + gen_b), gin = [w_t | w_t - w_star | onehot]
        # merged:  w_t @ (gWa+gWb)  +  select(onehot -> gWc row)  +  (gen_b - w_star @ gWb)
        z_row = jnp.dot(w_t, gWab, preferred_element_type=f32) + gb_eff  # (1, GEN_OUT)
        z_oh = jnp.where(cls_col > 0.5, gWc1, gWc0)                      # (B, GEN_OUT) VPU select
        return jnp.tanh(z_row + z_oh)

    # ----------------------------- forward: unroll loop -----------------------
    student_w = w0
    new_weight = w0
    loss_stu = jnp.zeros((1, 1), f32)
    w_t = w0
    saved = []
    for k in range(N_UNROLL):                    # static unroll (N_UNROLL = 3)
        sw = student_w                           # torch re-wraps in nn.Parameter -> detached
        w_t = sw * lax.rsqrt(jnp.sum(sw * sw, axis=1, keepdims=True))
        # lane 1 of the packed row tile = onehot[:, 1] = float class label = BCE target
        cls_k = rows_ref[k * B:(k + 1) * B, 1:2]                         # (B, 1)

        a_k = gen_forward(w_t, cls_k)                                    # (B, GEN_OUT)
        xp_k = jnp.dot(a_k, proj, preferred_element_type=f32)           # (B, P)
        zs_k = jnp.sum(xp_k * sw, axis=1, keepdims=True)                # student logit
        s_k = sigmoid(zs_k)
        g_k = jnp.sum((s_k - cls_k) * xp_k, axis=0, keepdims=True) * (1.0 / B)   # analytic BCE grad
        new_weight = new_weight - LR * g_k
        student_w = new_weight
        zt_k = jnp.sum(xp_k * tea_w, axis=1, keepdims=True)             # teacher logit
        t_k = sigmoid(zt_k)
        loss_stu = loss_stu + bce_logits_mean(zt_k, cls_k)
        saved.append((w_t, sw, cls_k, a_k, xp_k, s_k))

    w_loss = jnp.sum((w_star - new_weight) ** 2, keepdims=True)          # (1, 1)

    # ----------------------------- forward: final gen + disc ------------------
    cls_f = rows_ref[3 * B:4 * B, 1:2]           # (B, 1) generated_labels (float)
    zd_const = rows_ref[3 * B:4 * B, 2:3]        # (B, 1) disc fill/bias term (const wrt generator)
    real = rows_ref[3 * B:4 * B, 3:4]            # (B, 1)

    a_f = gen_forward(w_t, cls_f)                # generated samples, flattened
    samples_ref[...] = a_f
    zd = jnp.sum(a_f * dWs, axis=1, keepdims=True) + zd_const            # (B, 1) disc logit
    p_d = sigmoid(zd)
    g_loss = bce_logits_mean(zd, real)                                   # (1, 1)
    loss_total = loss_stu + w_loss + TAU * g_loss                        # torch returns this as loss_stu

    # packed small outputs: lane 0 = z_out, [0,1] = total loss, [0,2] = g_loss
    lane = lax.broadcasted_iota(jnp.int32, (B, 128), 1)
    row = lax.broadcasted_iota(jnp.int32, (B, 128), 0)
    misc_ref[...] = jnp.where(lane == 0, p_d,
                    jnp.where((lane == 1) & (row == 0), loss_total,
                    jnp.where((lane == 2) & (row == 0), g_loss, 0.0)))

    # --------------- analytic backward wrt generator params (gW, gb) ----------
    # d total / d g_k (same for every step, via w_loss = ||w* - (w0 - lr*sum g_k)||^2)
    gbar = (2.0 * LR) * (w_star - new_weight)                            # (1, P)

    gz_list = []
    wt_list = []
    for (w_t_k, sw_k, cls_k, a_k, xp_k, s_k) in saved:
        t_k = sigmoid(jnp.sum(xp_k * tea_w, axis=1, keepdims=True))
        c_k = jnp.sum(xp_k * gbar, axis=1, keepdims=True)                # (B, 1)
        # d total / d xp_k:
        #   teacher BCE term + (via w_loss) first-order term + second-order (create_graph) term
        G_xp = ((t_k - cls_k) * tea_w
                + (s_k - cls_k) * gbar
                + (c_k * s_k * (1.0 - s_k)) * sw_k) * (1.0 / B)          # (B, P)
        G_a = jnp.dot(G_xp, projT, preferred_element_type=f32)           # (B, GEN_OUT)
        gz_list.append(G_a * (1.0 - a_k * a_k))                          # through tanh
        wt_list.append(jnp.broadcast_to(w_t_k, (B, P)))

    # final pass: d (tau * g_loss) / d generator params
    dzd = (TAU / B) * (p_d - real)                                       # (B, 1)
    gz_list.append((dzd * dWs) * (1.0 - a_f * a_f))
    wt_list.append(jnp.broadcast_to(w_t, (B, P)))

    GZ = jnp.concatenate(gz_list, axis=0)                                # (4B, GEN_OUT)
    WT = jnp.concatenate(wt_list, axis=0)                                # (4B, P)
    OH = rows_ref[:, 0:2]                                                # (4B, C) onehot rows

    def bt_dot(x, y):
        # (R, M) x (R, N) -> (M, N): contraction over the stacked batch/pass axis.
        # Only the tiny LHS (4B x {P,C}) needs an XLU transpose.
        return lax.dot_general(x, y, (((0,), (0,)), ((), ())), preferred_element_type=f32)

    dgaT = bt_dot(WT, GZ)                                                # (P, GEN_OUT)
    dgbT = bt_dot(WT - w_star, GZ)                                       # (P, GEN_OUT)
    dgcT = bt_dot(OH, GZ)                                                # (C, GEN_OUT)
    dgbias = dgcT[0:1, :] + dgcT[1:2, :]                                 # (1, GEN_OUT) = colsum(GZ)

    # lane-dense packed gradient slab (transposed layout; single .T in the wrapper)
    slab_ref[0:P, :] = dgaT
    slab_ref[P:2 * P, :] = dgbT
    slab_ref[2 * P:2 * P + N_CLASSES, :] = dgcT
    slab_ref[2 * P + N_CLASSES:SLAB_ROWS, :] = dgbias


# ----------------------------- forward wrapper (jitted) ------------------------
def _gather_step_labels(Y, key):
    # traced replacement for torch.randint(...).item() + data_sampler (no host sync)
    batch_ids = jax.random.randint(key, (N_UNROLL,), 0, NB_BATCH)
    rows = (batch_ids[:, None] * BATCH_SIZE
            + jnp.arange(BATCH_SIZE)[None, :]).reshape(-1)               # (N_UNROLL*B,)
    y_sel = Y[rows]
    onehot = jnp.eye(N_CLASSES, dtype=jnp.float32)
    return onehot[y_sel], y_sel.astype(jnp.float32)[:, None]


@jax.jit
def unrolled_optimizer_forward(params, w_star, generated_labels, real, epoch, key):
    """Returns (grad_stu, loss_stu, g_loss, z_out, generated_samples) like the torch module.
    NOTE: as in the torch source, the returned 'loss_stu' is the TOTAL loss
    (student BCE + ||w*-w||^2 + tau*g_loss)."""
    del epoch  # unused by the torch forward as well
    onehot = jnp.eye(N_CLASSES, dtype=jnp.float32)
    fill = onehot[:, :, None, None] * jnp.ones((1, 1, IMG_SIZE, IMG_SIZE), jnp.float32)

    oh_steps, _ = _gather_step_labels(params["Y"], key)                  # (N_UNROLL*B, C)

    gen_W, gen_b = params["gen_W"], params["gen_b"]
    proj = params["proj_matrix"]
    disc_W, disc_b = params["disc_W"], params["disc_b"]

    # hoisted splits / merges / transposes (done once, resident in VMEM for the whole kernel)
    gWa = gen_W[:, :PROJ_DIM].T
    gWb = gen_W[:, PROJ_DIM:2 * PROJ_DIM].T
    gWab = gWa + gWb                                                     # (P, GEN_OUT)
    gWc = gen_W[:, 2 * PROJ_DIM:].T                                      # (C, GEN_OUT)
    gb_eff = gen_b - jnp.dot(w_star, gWb)                                # (1, GEN_OUT)
    projT = proj.T
    dWs = disc_W[:, :GEN_OUT]

    gl_onehot = onehot[generated_labels]                                 # (B, C)
    gl_fill_flat = fill[generated_labels].reshape(BATCH_SIZE, -1)        # (B, C*H*W)
    # constant (w.r.t. generator) part of the discriminator logit
    zd_const = jnp.sum(gl_fill_flat * disc_W[:, GEN_OUT:], axis=1, keepdims=True) + disc_b

    # pack all small per-row operands into ONE lane-dense (4B, 128) tile (single DMA):
    #   rows 0:3B  -> unroll steps : lanes 0:2 = onehot (lane 1 doubles as the float label/target)
    #   rows 3B:4B -> final pass   : lanes 0:2 = gl onehot, lane 2 = zd_const, lane 3 = real
    rows = jnp.zeros((4 * BATCH_SIZE, 128), jnp.float32)
    rows = rows.at[:3 * BATCH_SIZE, 0:2].set(oh_steps)
    rows = rows.at[3 * BATCH_SIZE:, 0:2].set(gl_onehot)
    rows = rows.at[3 * BATCH_SIZE:, 2:3].set(zd_const)
    rows = rows.at[3 * BATCH_SIZE:, 3:4].set(real)

    # pack w0 / w_star / teacher_w into one tiny tile
    vecs = jnp.concatenate([params["student_w0"], w_star, params["teacher_w"]], axis=0)  # (3, P)

    out_shapes = (
        jax.ShapeDtypeStruct((SLAB_ROWS, GEN_OUT), jnp.float32),         # packed grad slab (67, 256)
        jax.ShapeDtypeStruct((BATCH_SIZE, GEN_OUT), jnp.float32),        # generated samples
        jax.ShapeDtypeStruct((BATCH_SIZE, 128), jnp.float32),            # z_out + packed scalars
    )
    slab, samples_flat, misc = pl.pallas_call(
        _fused_unrolled_kernel,
        out_shape=out_shapes,
        in_specs=[_VMEM()] * 8,
        out_specs=tuple(_VMEM() for _ in range(3)),
        cost_estimate=pl.CostEstimate(flops=3_000_000, transcendentals=4_000,
                                      bytes_accessed=350_000),
    )(vecs, rows, gWab, gWc, gb_eff, proj, projT, dWs)

    grad_gW = slab[:2 * PROJ_DIM + N_CLASSES, :].T                       # (GEN_OUT, GEN_IN)
    grad_gb = slab[2 * PROJ_DIM + N_CLASSES:, :]                         # (1, GEN_OUT)
    grad_stu = (grad_gW, grad_gb)
    loss_stu = misc[0, 1]                                                # total loss (see docstring)
    g_loss = misc[0, 2]
    z_out = misc[:, 0:1]                                                 # (B, 1)
    generated_samples = samples_flat.reshape(BATCH_SIZE, 1, IMG_SIZE, IMG_SIZE)   # NCHW
    return grad_stu, loss_stu, g_loss, z_out, generated_samples


# ------------------- plain-JAX autodiff reference (debug/test only) -----------
def _reference_forward(params, w_star, generated_labels, real, key):
    hi = lax.Precision.HIGHEST
    onehot = jnp.eye(N_CLASSES, dtype=jnp.float32)
    fill = onehot[:, :, None, None] * jnp.ones((1, 1, IMG_SIZE, IMG_SIZE), jnp.float32)
    oh_steps, y_steps = _gather_step_labels(params["Y"], key)
    gl_onehot = onehot[generated_labels]
    gl_fill_flat = fill[generated_labels].reshape(BATCH_SIZE, -1)
    proj, tea_w = params["proj_matrix"], params["teacher_w"]
    disc_W, disc_b = params["disc_W"], params["disc_b"]
    w0 = params["student_w0"]

    def total_loss(gen_params):
        gW, gb = gen_params
        student_w = w0
        new_weight = w0
        loss_stu = 0.0
        w_t = w0
        for k in range(N_UNROLL):
            sw = lax.stop_gradient(student_w)        # torch re-wraps nn.Parameter -> detach
            w_t = sw / jnp.linalg.norm(sw)
            oh_k = oh_steps[k * BATCH_SIZE:(k + 1) * BATCH_SIZE]
            y_k = y_steps[k * BATCH_SIZE:(k + 1) * BATCH_SIZE]
            w = jnp.tile(jnp.concatenate([w_t, w_t - w_star], axis=1), (BATCH_SIZE, 1))
            gin = jnp.concatenate([w, oh_k], axis=1)
            a = jnp.tanh(jnp.dot(gin, gW.T, precision=hi) + gb)
            xp = jnp.dot(a, proj, precision=hi)
            s = _sigmoid(jnp.sum(xp * sw, axis=1, keepdims=True))
            g = jnp.sum((s - y_k) * xp, axis=0, keepdims=True) / BATCH_SIZE
            new_weight = new_weight - LR * g
            student_w = new_weight
            t = _sigmoid(jnp.sum(xp * tea_w, axis=1, keepdims=True))
            loss_stu = loss_stu + jnp.mean(_bce(t, y_k))
        w_loss = jnp.sum((w_star - new_weight) ** 2)
        w = jnp.tile(jnp.concatenate([w_t, w_t - w_star], axis=1), (BATCH_SIZE, 1))
        gin = jnp.concatenate([w, gl_onehot], axis=1)
        a_f = jnp.tanh(jnp.dot(gin, gW.T, precision=hi) + gb)
        zd = (jnp.sum(a_f * disc_W[:, :GEN_OUT], axis=1, keepdims=True)
              + jnp.sum(gl_fill_flat * disc_W[:, GEN_OUT:], axis=1, keepdims=True) + disc_b)
        p_d = _sigmoid(zd)
        g_loss = jnp.mean(_bce(p_d, real))
        return loss_stu + w_loss + g_loss * TAU, (g_loss, p_d, a_f)

    (total, (g_loss, z_out, a_f)), grads = jax.value_and_grad(total_loss, has_aux=True)(
        (params["gen_W"], params["gen_b"]))
    return grads, total, g_loss, z_out, a_f.reshape(BATCH_SIZE, 1, IMG_SIZE, IMG_SIZE)


def _assert_close(a, b, name, rtol=2e-2, atol=1e-4):
    a = jnp.asarray(a)
    b = jnp.asarray(b)
    err = float(jnp.max(jnp.abs(a - b)))
    scale = float(jnp.max(jnp.abs(b)))
    assert err <= atol + rtol * scale, f"{name}: max|diff|={err:.3e} scale={scale:.3e}"


# ----------------------------------- main --------------------------------------
if __name__ == "__main__":
    key = jax.random.PRNGKey(0)
    ks = jax.random.split(key, 10)

    params = {
        "gen_W": 0.1 * jax.random.normal(ks[0], (GEN_OUT, GEN_IN), jnp.float32),
        "gen_b": 0.01 * jax.random.normal(ks[1], (1, GEN_OUT), jnp.float32),
        "teacher_w": 0.5 * jax.random.normal(ks[2], (1, PROJ_DIM), jnp.float32),
        "student_w0": 0.5 * jax.random.normal(ks[3], (1, PROJ_DIM), jnp.float32),
        "disc_W": 0.05 * jax.random.normal(ks[4], (1, DISC_IN), jnp.float32),
        "disc_b": jnp.zeros((1, 1), jnp.float32),
        "proj_matrix": jax.random.normal(ks[5], (GEN_OUT, PROJ_DIM), jnp.float32)
                       / jnp.sqrt(float(GEN_OUT)),
        # dataset (X is only touched by dead code in the torch forward, kept for parity)
        "X": jax.random.normal(ks[6], (NB_BATCH * BATCH_SIZE, GEN_OUT), jnp.float32),
        "Y": jax.random.randint(ks[7], (NB_BATCH * BATCH_SIZE,), 0, N_CLASSES),
    }
    w_star = params["teacher_w"]            # teacher loads 'teacher_wstar.pth' in torch
    generated_labels = jax.random.randint(ks[8], (BATCH_SIZE,), 0, N_CLASSES)
    real = jnp.ones((BATCH_SIZE, 1), jnp.float32)

    outputs = unrolled_optimizer_forward(
        params, w_star, generated_labels, real, 0, ks[9])
    grad_stu, loss_stu, g_loss, z_out, generated_samples = jax.block_until_ready(outputs)

    assert grad_stu[0].shape == (GEN_OUT, GEN_IN) and grad_stu[1].shape == (1, GEN_OUT)
    assert z_out.shape == (BATCH_SIZE, 1)
    assert generated_samples.shape == (BATCH_SIZE, 1, IMG_SIZE, IMG_SIZE)

    # one-time numerical check against a plain-JAX autodiff reference (debug path only,
    # deliberately kept OUT of the jitted hot path)
    ref_grads, ref_loss, ref_gloss, ref_zout, ref_samples = _reference_forward(
        params, w_star, generated_labels, real, ks[9])
    _assert_close(loss_stu, ref_loss, "loss_stu")
    _assert_close(g_loss, ref_gloss, "g_loss")
    _assert_close(z_out, ref_zout, "z_out")
    _assert_close(generated_samples, ref_samples, "generated_samples")
    _assert_close(grad_stu[0], ref_grads[0], "grad_gen_W")
    _assert_close(grad_stu[1], ref_grads[1], "grad_gen_b")

    print("KERNEL_OK")
</pallas_src>

<mosaic_0001>
module attributes {stable_mosaic.version = 11 : i64} {
  func.func @_fused_unrolled_kernel(%arg0: memref<3x32xf32, #tpu.memory_space<vmem>>, %arg1: memref<32x128xf32, #tpu.memory_space<vmem>>, %arg2: memref<32x256xf32, #tpu.memory_space<vmem>>, %arg3: memref<2x256xf32, #tpu.memory_space<vmem>>, %arg4: memref<1x256xf32, #tpu.memory_space<vmem>>, %arg5: memref<256x32xf32, #tpu.memory_space<vmem>>, %arg6: memref<32x256xf32, #tpu.memory_space<vmem>>, %arg7: memref<1x256xf32, #tpu.memory_space<vmem>>, %arg8: memref<67x256xf32, #tpu.memory_space<vmem>>, %arg9: memref<8x256xf32, #tpu.memory_space<vmem>>, %arg10: memref<8x128xf32, #tpu.memory_space<vmem>>) attributes {dimension_semantics = [], scalar_prefetch = 0 : i64, scratch_operands = 0 : i64, tpu.core_type = #tpu.core_type<tc>} {
    %c0 = arith.constant 0 : index
    %c0_0 = arith.constant 0 : index
    %0 = vector.load %arg0[%c0, %c0_0] : memref<3x32xf32, #tpu.memory_space<vmem>>, vector<1x32xf32>
    %c1 = arith.constant 1 : index
    %c0_1 = arith.constant 0 : index
    %1 = vector.load %arg0[%c1, %c0_1] : memref<3x32xf32, #tpu.memory_space<vmem>>, vector<1x32xf32>
    %c2 = arith.constant 2 : index
    %c0_2 = arith.constant 0 : index
    %2 = vector.load %arg0[%c2, %c0_2] : memref<3x32xf32, #tpu.memory_space<vmem>>, vector<1x32xf32>
    %c0_3 = arith.constant 0 : index
    %c0_4 = arith.constant 0 : index
    %3 = vector.load %arg2[%c0_3, %c0_4] : memref<32x256xf32, #tpu.memory_space<vmem>>, vector<32x256xf32>
    %c0_5 = arith.constant 0 : index
    %c0_6 = arith.constant 0 : index
    %4 = vector.load %arg3[%c0_5, %c0_6] : memref<2x256xf32, #tpu.memory_space<vmem>>, vector<1x256xf32>
    %c1_7 = arith.constant 1 : index
    %c0_8 = arith.constant 0 : index
    %5 = vector.load %arg3[%c1_7, %c0_8] : memref<2x256xf32, #tpu.memory_space<vmem>>, vector<1x256xf32>
    %c0_9 = arith.constant 0 : index
    %c0_10 = arith.constant 0 : index
    %6 = vector.load %arg4[%c0_9, %c0_10] : memref<1x256xf32, #tpu.memory_space<vmem>>, vector<1x256xf32>
    %c0_11 = arith.constant 0 : index
    %c0_12 = arith.constant 0 : index
    %7 = vector.load %arg5[%c0_11, %c0_12] : memref<256x32xf32, #tpu.memory_space<vmem>>, vector<256x32xf32>
    %c0_13 = arith.constant 0 : index
    %c0_14 = arith.constant 0 : index
    %8 = vector.load %arg6[%c0_13, %c0_14] : memref<32x256xf32, #tpu.memory_space<vmem>>, vector<32x256xf32>
    %c0_15 = arith.constant 0 : index
    %c0_16 = arith.constant 0 : index
    %9 = vector.load %arg7[%c0_15, %c0_16] : memref<1x256xf32, #tpu.memory_space<vmem>>, vector<1x256xf32>
    %cst = arith.constant 0.000000e+00 : f32
    %10 = vector.broadcast %cst : f32 to vector<1x1xf32>
    %11 = arith.mulf %0, %0 : vector<1x32xf32>
    %cst_17 = arith.constant dense<0.000000e+00> : vector<1xf32>
    %12 = vector.multi_reduction <add>, %11, %cst_17 [1] : vector<1x32xf32> to vector<1xf32>
    %13 = vector.shape_cast %12 : vector<1xf32> to vector<1x1xf32>
    %14 = math.rsqrt %13 : vector<1x1xf32>
    %15 = vector.broadcast %14 : vector<1x1xf32> to vector<1x32xf32>
    %16 = arith.mulf %0, %15 : vector<1x32xf32>
    %c0_18 = arith.constant 0 : index
    %c1_19 = arith.constant 1 : index
    %17 = vector.load %arg1[%c0_18, %c1_19] : memref<32x128xf32, #tpu.memory_space<vmem>>, vector<8x1xf32>
    %cst_20 = arith.constant dense<0.000000e+00> : vector<1x256xf32>
    %18 = tpu.matmul %16, %3, %cst_20 {dimension_numbers = #tpu.dot_dimension_numbers<[1], [0], [0], [1], [0, 0, 1, 1], [], []>} : vector<1x32xf32>, vector<32x256xf32>, vector<1x256xf32> -> vector<1x256xf32>
    %19 = arith.addf %18, %6 : vector<1x256xf32>
    %cst_21 = arith.constant 5.000000e-01 : f32
    %20 = vector.broadcast %cst_21 : f32 to vector<8x1xf32>
    %21 = arith.cmpf ogt, %17, %20 : vector<8x1xf32>
    %22 = vector.shape_cast %21 : vector<8x1xi1> to vector<8x1xi1>
    %23 = vector.broadcast %22 : vector<8x1xi1> to vector<8x256xi1>
    %24 = vector.shape_cast %5 : vector<1x256xf32> to vector<1x256xf32>
    %25 = vector.broadcast %24 : vector<1x256xf32> to vector<8x256xf32>
    %26 = vector.shape_cast %4 : vector<1x256xf32> to vector<1x256xf32>
    %27 = vector.broadcast %26 : vector<1x256xf32> to vector<8x256xf32>
    %28 = arith.select %23, %25, %27 : vector<8x256xi1>, vector<8x256xf32>
    %29 = vector.broadcast %19 : vector<1x256xf32> to vector<8x256xf32>
    %30 = arith.addf %29, %28 : vector<8x256xf32>
    %31 = math.tanh %30 : vector<8x256xf32>
    %cst_22 = arith.constant dense<0.000000e+00> : vector<8x32xf32>
    %32 = tpu.matmul %31, %7, %cst_22 {dimension_numbers = #tpu.dot_dimension_numbers<[1], [0], [0], [1], [0, 0, 1, 1], [], []>} : vector<8x256xf32>, vector<256x32xf32>, vector<8x32xf32> -> vector<8x32xf32>
    %33 = vector.broadcast %0 : vector<1x32xf32> to vector<8x32xf32>
    %34 = arith.mulf %32, %33 : vector<8x32xf32>
    %cst_23 = arith.constant dense<0.000000e+00> : vector<8xf32>
    %35 = vector.multi_reduction <add>, %34, %cst_23 [1] : vector<8x32xf32> to vector<8xf32>
    %36 = vector.shape_cast %35 : vector<8xf32> to vector<8x1xf32>
    %cst_24 = arith.constant 0.000000e+00 : f32
    %37 = vector.broadcast %cst_24 : f32 to vector<8x1xf32>
    %38 = arith.subf %37, %36 : vector<8x1xf32>
    %39 = math.exp %38 : vector<8x1xf32>
    %cst_25 = arith.constant 1.000000e+00 : f32
    %40 = vector.broadcast %cst_25 : f32 to vector<8x1xf32>
    %41 = arith.addf %40, %39 : vector<8x1xf32>
    %42 = tpu.reciprocal %41 {approx = true} : vector<8x1xf32> -> vector<8x1xf32>
    %43 = arith.subf %42, %17 : vector<8x1xf32>
    %44 = vector.broadcast %43 : vector<8x1xf32> to vector<8x32xf32>
    %45 = arith.mulf %44, %32 : vector<8x32xf32>
    %cst_26 = arith.constant dense<0.000000e+00> : vector<32xf32>
    %46 = vector.multi_reduction <add>, %45, %cst_26 [0] : vector<8x32xf32> to vector<32xf32>
    %47 = vector.shape_cast %46 : vector<32xf32> to vector<1x32xf32>
    %cst_27 = arith.constant 1.250000e-01 : f32
    %48 = vector.broadcast %cst_27 : f32 to vector<1x32xf32>
    %49 = arith.mulf %47, %48 : vector<1x32xf32>
    %cst_28 = arith.constant 1.000000e-03 : f32
    %50 = vector.broadcast %cst_28 : f32 to vector<1x32xf32>
    %51 = arith.mulf %50, %49 : vector<1x32xf32>
    %52 = arith.subf %0, %51 : vector<1x32xf32>
    %53 = vector.broadcast %2 : vector<1x32xf32> to vector<8x32xf32>
    %54 = arith.mulf %32, %53 : vector<8x32xf32>
    %cst_29 = arith.constant dense<0.000000e+00> : vector<8xf32>
    %55 = vector.multi_reduction <add>, %54, %cst_29 [1] : vector<8x32xf32> to vector<8xf32>
    %56 = vector.shape_cast %55 : vector<8xf32> to vector<8x1xf32>
    %cst_30 = arith.constant 0.000000e+00 : f32
    %57 = vector.broadcast %cst_30 : f32 to vector<8x1xf32>
    %58 = arith.maximumf %56, %57 : vector<8x1xf32>
    %59 = arith.mulf %17, %56 : vector<8x1xf32>
    %60 = arith.subf %58, %59 : vector<8x1xf32>
    %61 = math.absf %56 : vector<8x1xf32>
    %cst_31 = arith.constant 0.000000e+00 : f32
    %62 = vector.broadcast %cst_31 : f32 to vector<8x1xf32>
    %63 = arith.subf %62, %61 : vector<8x1xf32>
    %64 = math.exp %63 : vector<8x1xf32>
    %cst_32 = arith.constant 1.000000e+00 : f32
    %65 = vector.broadcast %cst_32 : f32 to vector<8x1xf32>
    %66 = arith.addf %65, %64 : vector<8x1xf32>
    %67 = math.log %66 : vector<8x1xf32>
    %68 = arith.addf %60, %67 : vector<8x1xf32>
    %69 = vector.shape_cast %68 : vector<8x1xf32> to vector<1x8x1xf32>
    %cst_33 = arith.constant dense<0.000000e+00> : vector<1xf32>
    %70 = vector.multi_reduction <add>, %69, %cst_33 [1, 2] : vector<1x8x1xf32> to vector<1xf32>
    %71 = vector.shape_cast %70 : vector<1xf32> to vector<1x1x1xf32>
    %72 = vector.extract %71[0, 0, 0] : f32 from vector<1x1x1xf32>
    %73 = vector.broadcast %72 : f32 to vector<1x1xf32>
    %cst_34 = arith.constant 8.000000e+00 : f32
    %74 = vector.broadcast %cst_34 : f32 to vector<1x1xf32>
    %75 = arith.divf %73, %74 : vector<1x1xf32>
    %76 = arith.addf %10, %75 : vector<1x1xf32>
    %77 = arith.mulf %52, %52 : vector<1x32xf32>
    %cst_35 = arith.constant dense<0.000000e+00> : vector<1xf32>
    %78 = vector.multi_reduction <add>, %77, %cst_35 [1] : vector<1x32xf32> to vector<1xf32>
    %79 = vector.shape_cast %78 : vector<1xf32> to vector<1x1xf32>
    %80 = math.rsqrt %79 : vector<1x1xf32>
    %81 = vector.broadcast %80 : vector<1x1xf32> to vector<1x32xf32>
    %82 = arith.mulf %52, %81 : vector<1x32xf32>
    %c8 = arith.constant 8 : index
    %c1_36 = arith.constant 1 : index
    %83 = vector.load %arg1[%c8, %c1_36] : memref<32x128xf32, #tpu.memory_space<vmem>>, vector<8x1xf32>
    %cst_37 = arith.constant dense<0.000000e+00> : vector<1x256xf32>
    %84 = tpu.matmul %82, %3, %cst_37 {dimension_numbers = #tpu.dot_dimension_numbers<[1], [0], [0], [1], [0, 0, 1, 1], [], []>} : vector<1x32xf32>, vector<32x256xf32>, vector<1x256xf32> -> vector<1x256xf32>
    %85 = arith.addf %84, %6 : vector<1x256xf32>
    %cst_38 = arith.constant 5.000000e-01 : f32
    %86 = vector.broadcast %cst_38 : f32 to vector<8x1xf32>
    %87 = arith.cmpf ogt, %83, %86 : vector<8x1xf32>
    %88 = vector.shape_cast %87 : vector<8x1xi1> to vector<8x1xi1>
    %89 = vector.broadcast %88 : vector<8x1xi1> to vector<8x256xi1>
    %90 = vector.shape_cast %5 : vector<1x256xf32> to vector<1x256xf32>
    %91 = vector.broadcast %90 : vector<1x256xf32> to vector<8x256xf32>
    %92 = vector.shape_cast %4 : vector<1x256xf32> to vector<1x256xf32>
    %93 = vector.broadcast %92 : vector<1x256xf32> to vector<8x256xf32>
    %94 = arith.select %89, %91, %93 : vector<8x256xi1>, vector<8x256xf32>
    %95 = vector.broadcast %85 : vector<1x256xf32> to vector<8x256xf32>
    %96 = arith.addf %95, %94 : vector<8x256xf32>
    %97 = math.tanh %96 : vector<8x256xf32>
    %cst_39 = arith.constant dense<0.000000e+00> : vector<8x32xf32>
    %98 = tpu.matmul %97, %7, %cst_39 {dimension_numbers = #tpu.dot_dimension_numbers<[1], [0], [0], [1], [0, 0, 1, 1], [], []>} : vector<8x256xf32>, vector<256x32xf32>, vector<8x32xf32> -> vector<8x32xf32>
    %99 = vector.broadcast %52 : vector<1x32xf32> to vector<8x32xf32>
    %100 = arith.mulf %98, %99 : vector<8x32xf32>
    %cst_40 = arith.constant dense<0.000000e+00> : vector<8xf32>
    %101 = vector.multi_reduction <add>, %100, %cst_40 [1] : vector<8x32xf32> to vector<8xf32>
    %102 = vector.shape_cast %101 : vector<8xf32> to vector<8x1xf32>
    %cst_41 = arith.constant 0.000000e+00 : f32
    %103 = vector.broadcast %cst_41 : f32 to vector<8x1xf32>
    %104 = arith.subf %103, %102 : vector<8x1xf32>
    %105 = math.exp %104 : vector<8x1xf32>
    %cst_42 = arith.constant 1.000000e+00 : f32
    %106 = vector.broadcast %cst_42 : f32 to vector<8x1xf32>
    %107 = arith.addf %106, %105 : vector<8x1xf32>
    %108 = tpu.reciprocal %107 {approx = true} : vector<8x1xf32> -> vector<8x1xf32>
    %109 = arith.subf %108, %83 : vector<8x1xf32>
    %110 = vector.broadcast %109 : vector<8x1xf32> to vector<8x32xf32>
    %111 = arith.mulf %110, %98 : vector<8x32xf32>
    %cst_43 = arith.constant dense<0.000000e+00> : vector<32xf32>
    %112 = vector.multi_reduction <add>, %111, %cst_43 [0] : vector<8x32xf32> to vector<32xf32>
    %113 = vector.shape_cast %112 : vector<32xf32> to vector<1x32xf32>
    %cst_44 = arith.constant 1.250000e-01 : f32
    %114 = vector.broadcast %cst_44 : f32 to vector<1x32xf32>
    %115 = arith.mulf %113, %114 : vector<1x32xf32>
    %cst_45 = arith.constant 1.000000e-03 : f32
    %116 = vector.broadcast %cst_45 : f32 to vector<1x32xf32>
    %117 = arith.mulf %116, %115 : vector<1x32xf32>
    %118 = arith.subf %52, %117 : vector<1x32xf32>
    %119 = vector.broadcast %2 : vector<1x32xf32> to vector<8x32xf32>
    %120 = arith.mulf %98, %119 : vector<8x32xf32>
    %cst_46 = arith.constant dense<0.000000e+00> : vector<8xf32>
    %121 = vector.multi_reduction <add>, %120, %cst_46 [1] : vector<8x32xf32> to vector<8xf32>
    %122 = vector.shape_cast %121 : vector<8xf32> to vector<8x1xf32>
    %cst_47 = arith.constant 0.000000e+00 : f32
    %123 = vector.broadcast %cst_47 : f32 to vector<8x1xf32>
    %124 = arith.maximumf %122, %123 : vector<8x1xf32>
    %125 = arith.mulf %83, %122 : vector<8x1xf32>
    %126 = arith.subf %124, %125 : vector<8x1xf32>
    %127 = math.absf %122 : vector<8x1xf32>
    %cst_48 = arith.constant 0.000000e+00 : f32
    %128 = vector.broadcast %cst_48 : f32 to vector<8x1xf32>
    %129 = arith.subf %128, %127 : vector<8x1xf32>
    %130 = math.exp %129 : vector<8x1xf32>
    %cst_49 = arith.constant 1.000000e+00 : f32
    %131 = vector.broadcast %cst_49 : f32 to vector<8x1xf32>
    %132 = arith.addf %131, %130 : vector<8x1xf32>
    %133 = math.log %132 : vector<8x1xf32>
    %134 = arith.addf %126, %133 : vector<8x1xf32>
    %135 = vector.shape_cast %134 : vector<8x1xf32> to vector<1x8x1xf32>
    %cst_50 = arith.constant dense<0.000000e+00> : vector<1xf32>
    %136 = vector.multi_reduction <add>, %135, %cst_50 [1, 2] : vector<1x8x1xf32> to vector<1xf32>
    %137 = vector.shape_cast %136 : vector<1xf32> to vector<1x1x1xf32>
    %138 = vector.extract %137[0, 0, 0] : f32 from vector<1x1x1xf32>
    %139 = vector.broadcast %138 : f32 to vector<1x1xf32>
    %cst_51 = arith.constant 8.000000e+00 : f32
    %140 = vector.broadcast %cst_51 : f32 to vector<1x1xf32>
    %141 = arith.divf %139, %140 : vector<1x1xf32>
    %142 = arith.addf %76, %141 : vector<1x1xf32>
    %143 = arith.mulf %118, %118 : vector<1x32xf32>
    %cst_52 = arith.constant dense<0.000000e+00> : vector<1xf32>
    %144 = vector.multi_reduction <add>, %143, %cst_52 [1] : vector<1x32xf32> to vector<1xf32>
    %145 = vector.shape_cast %144 : vector<1xf32> to vector<1x1xf32>
    %146 = math.rsqrt %145 : vector<1x1xf32>
    %147 = vector.broadcast %146 : vector<1x1xf32> to vector<1x32xf32>
    %148 = arith.mulf %118, %147 : vector<1x32xf32>
    %c16 = arith.constant 16 : index
    %c1_53 = arith.constant 1 : index
    %149 = vector.load %arg1[%c16, %c1_53] : memref<32x128xf32, #tpu.memory_space<vmem>>, vector<8x1xf32>
    %cst_54 = arith.constant dense<0.000000e+00> : vector<1x256xf32>
    %150 = tpu.matmul %148, %3, %cst_54 {dimension_numbers = #tpu.dot_dimension_numbers<[1], [0], [0], [1], [0, 0, 1, 1], [], []>} : vector<1x32xf32>, vector<32x256xf32>, vector<1x256xf32> -> vector<1x256xf32>
    %151 = arith.addf %150, %6 : vector<1x256xf32>
    %cst_55 = arith.constant 5.000000e-01 : f32
    %152 = vector.broadcast %cst_55 : f32 to vector<8x1xf32>
    %153 = arith.cmpf ogt, %149, %152 : vector<8x1xf32>
    %154 = vector.shape_cast %153 : vector<8x1xi1> to vector<8x1xi1>
    %155 = vector.broadcast %154 : vector<8x1xi1> to vector<8x256xi1>
    %156 = vector.shape_cast %5 : vector<1x256xf32> to vector<1x256xf32>
    %157 = vector.broadcast %156 : vector<1x256xf32> to vector<8x256xf32>
    %158 = vector.shape_cast %4 : vector<1x256xf32> to vector<1x256xf32>
    %159 = vector.broadcast %158 : vector<1x256xf32> to vector<8x256xf32>
    %160 = arith.select %155, %157, %159 : vector<8x256xi1>, vector<8x256xf32>
    %161 = vector.broadcast %151 : vector<1x256xf32> to vector<8x256xf32>
    %162 = arith.addf %161, %160 : vector<8x256xf32>
    %163 = math.tanh %162 : vector<8x256xf32>
    %cst_56 = arith.constant dense<0.000000e+00> : vector<8x32xf32>
    %164 = tpu.matmul %163, %7, %cst_56 {dimension_numbers = #tpu.dot_dimension_numbers<[1], [0], [0], [1], [0, 0, 1, 1], [], []>} : vector<8x256xf32>, vector<256x32xf32>, vector<8x32xf32> -> vector<8x32xf32>
    %165 = vector.broadcast %118 : vector<1x32xf32> to vector<8x32xf32>
    %166 = arith.mulf %164, %165 : vector<8x32xf32>
    %cst_57 = arith.constant dense<0.000000e+00> : vector<8xf32>
    %167 = vector.multi_reduction <add>, %166, %cst_57 [1] : vector<8x32xf32> to vector<8xf32>
    %168 = vector.shape_cast %167 : vector<8xf32> to vector<8x1xf32>
    %cst_58 = arith.constant 0.000000e+00 : f32
    %169 = vector.broadcast %cst_58 : f32 to vector<8x1xf32>
    %170 = arith.subf %169, %168 : vector<8x1xf32>
    %171 = math.exp %170 : vector<8x1xf32>
    %cst_59 = arith.constant 1.000000e+00 : f32
    %172 = vector.broadcast %cst_59 : f32 to vector<8x1xf32>
    %173 = arith.addf %172, %171 : vector<8x1xf32>
    %174 = tpu.reciprocal %173 {approx = true} : vector<8x1xf32> -> vector<8x1xf32>
    %175 = arith.subf %174, %149 : vector<8x1xf32>
    %176 = vector.broadcast %175 : vector<8x1xf32> to vector<8x32xf32>
    %177 = arith.mulf %176, %164 : vector<8x32xf32>
    %cst_60 = arith.constant dense<0.000000e+00> : vector<32xf32>
    %178 = vector.multi_reduction <add>, %177, %cst_60 [0] : vector<8x32xf32> to vector<32xf32>
    %179 = vector.shape_cast %178 : vector<32xf32> to vector<1x32xf32>
    %cst_61 = arith.constant 1.250000e-01 : f32
    %180 = vector.broadcast %cst_61 : f32 to vector<1x32xf32>
    %181 = arith.mulf %179, %180 : vector<1x32xf32>
    %cst_62 = arith.constant 1.000000e-03 : f32
    %182 = vector.broadcast %cst_62 : f32 to vector<1x32xf32>
    %183 = arith.mulf %182, %181 : vector<1x32xf32>
    %184 = arith.subf %118, %183 : vector<1x32xf32>
    %185 = vector.broadcast %2 : vector<1x32xf32> to vector<8x32xf32>
    %186 = arith.mulf %164, %185 : vector<8x32xf32>
    %cst_63 = arith.constant dense<0.000000e+00> : vector<8xf32>
    %187 = vector.multi_reduction <add>, %186, %cst_63 [1] : vector<8x32xf32> to vector<8xf32>
    %188 = vector.shape_cast %187 : vector<8xf32> to vector<8x1xf32>
    %cst_64 = arith.constant 0.000000e+00 : f32
    %189 = vector.broadcast %cst_64 : f32 to vector<8x1xf32>
    %190 = arith.maximumf %188, %189 : vector<8x1xf32>
    %191 = arith.mulf %149, %188 : vector<8x1xf32>
    %192 = arith.subf %190, %191 : vector<8x1xf32>
    %193 = math.absf %188 : vector<8x1xf32>
    %cst_65 = arith.constant 0.000000e+00 : f32
    %194 = vector.broadcast %cst_65 : f32 to vector<8x1xf32>
    %195 = arith.subf %194, %193 : vector<8x1xf32>
    %196 = math.exp %195 : vector<8x1xf32>
    %cst_66 = arith.constant 1.000000e+00 : f32
    %197 = vector.broadcast %cst_66 : f32 to vector<8x1xf32>
    %198 = arith.addf %197, %196 : vector<8x1xf32>
    %199 = math.log %198 : vector<8x1xf32>
    %200 = arith.addf %192, %199 : vector<8x1xf32>
    %201 = vector.shape_cast %200 : vector<8x1xf32> to vector<1x8x1xf32>
    %cst_67 = arith.constant dense<0.000000e+00> : vector<1xf32>
    %202 = vector.multi_reduction <add>, %201, %cst_67 [1, 2] : vector<1x8x1xf32> to vector<1xf32>
    %203 = vector.shape_cast %202 : vector<1xf32> to vector<1x1x1xf32>
    %204 = vector.extract %203[0, 0, 0] : f32 from vector<1x1x1xf32>
    %205 = vector.broadcast %204 : f32 to vector<1x1xf32>
    %cst_68 = arith.constant 8.000000e+00 : f32
    %206 = vector.broadcast %cst_68 : f32 to vector<1x1xf32>
    %207 = arith.divf %205, %206 : vector<1x1xf32>
    %208 = arith.addf %142, %207 : vector<1x1xf32>
    %209 = arith.subf %1, %184 : vector<1x32xf32>
    %210 = arith.mulf %209, %209 : vector<1x32xf32>
    %211 = vector.shape_cast %210 : vector<1x32xf32> to vector<1x1x32xf32>
    %cst_69 = arith.constant dense<0.000000e+00> : vector<1xf32>
    %212 = vector.multi_reduction <add>, %211, %cst_69 [1, 2] : vector<1x1x32xf32> to vector<1xf32>
    %213 = vector.shape_cast %212 : vector<1xf32> to vector<1x1x1xf32>
    %214 = vector.extract %213[0, 0, 0] : f32 from vector<1x1x1xf32>
    %215 = vector.broadcast %214 : f32 to vector<1x1xf32>
    %c24 = arith.constant 24 : index
    %c1_70 = arith.constant 1 : index
    %216 = vector.load %arg1[%c24, %c1_70] : memref<32x128xf32, #tpu.memory_space<vmem>>, vector<8x1xf32>
    %c24_71 = arith.constant 24 : index
    %c2_72 = arith.constant 2 : index
    %217 = vector.load %arg1[%c24_71, %c2_72] : memref<32x128xf32, #tpu.memory_space<vmem>>, vector<8x1xf32>
    %c24_73 = arith.constant 24 : index
    %c3 = arith.constant 3 : index
    %218 = vector.load %arg1[%c24_73, %c3] : memref<32x128xf32, #tpu.memory_space<vmem>>, vector<8x1xf32>
    %cst_74 = arith.constant dense<0.000000e+00> : vector<1x256xf32>
    %219 = tpu.matmul %148, %3, %cst_74 {dimension_numbers = #tpu.dot_dimension_numbers<[1], [0], [0], [1], [0, 0, 1, 1], [], []>} : vector<1x32xf32>, vector<32x256xf32>, vector<1x256xf32> -> vector<1x256xf32>
    %220 = arith.addf %219, %6 : vector<1x256xf32>
    %cst_75 = arith.constant 5.000000e-01 : f32
    %221 = vector.broadcast %cst_75 : f32 to vector<8x1xf32>
    %222 = arith.cmpf ogt, %216, %221 : vector<8x1xf32>
    %223 = vector.shape_cast %222 : vector<8x1xi1> to vector<8x1xi1>
    %224 = vector.broadcast %223 : vector<8x1xi1> to vector<8x256xi1>
    %225 = vector.shape_cast %5 : vector<1x256xf32> to vector<1x256xf32>
    %226 = vector.broadcast %225 : vector<1x256xf32> to vector<8x256xf32>
    %227 = vector.shape_cast %4 : vector<1x256xf32> to vector<1x256xf32>
    %228 = vector.broadcast %227 : vector<1x256xf32> to vector<8x256xf32>
    %229 = arith.select %224, %226, %228 : vector<8x256xi1>, vector<8x256xf32>
    %230 = vector.broadcast %220 : vector<1x256xf32> to vector<8x256xf32>
    %231 = arith.addf %230, %229 : vector<8x256xf32>
    %232 = math.tanh %231 : vector<8x256xf32>
    %c0_76 = arith.constant 0 : index
    %c0_77 = arith.constant 0 : index
    %233 = vector.load %arg9[%c0_76, %c0_77] : memref<8x256xf32, #tpu.memory_space<vmem>>, vector<8x256xf32>
    tpu.vector_store %arg9[%c0_76, %c0_77], %232 {strides = array<i32>} : memref<8x256xf32, #tpu.memory_space<vmem>>, vector<8x256xf32>,
    %234 = vector.broadcast %9 : vector<1x256xf32> to vector<8x256xf32>
    %235 = arith.mulf %232, %234 : vector<8x256xf32>
    %cst_78 = arith.constant dense<0.000000e+00> : vector<8xf32>
    %236 = vector.multi_reduction <add>, %235, %cst_78 [1] : vector<8x256xf32> to vector<8xf32>
    %237 = vector.shape_cast %236 : vector<8xf32> to vector<8x1xf32>
    %238 = arith.addf %237, %217 : vector<8x1xf32>
    %cst_79 = arith.constant 0.000000e+00 : f32
    %239 = vector.broadcast %cst_79 : f32 to vector<8x1xf32>
    %240 = arith.subf %239, %238 : vector<8x1xf32>
    %241 = math.exp %240 : vector<8x1xf32>
    %cst_80 = arith.constant 1.000000e+00 : f32
    %242 = vector.broadcast %cst_80 : f32 to vector<8x1xf32>
    %243 = arith.addf %242, %241 : vector<8x1xf32>
    %244 = tpu.reciprocal %243 {approx = true} : vector<8x1xf32> -> vector<8x1xf32>
    %cst_81 = arith.constant 0.000000e+00 : f32
    %245 = vector.broadcast %cst_81 : f32 to vector<8x1xf32>
    %246 = arith.maximumf %238, %245 : vector<8x1xf32>
    %247 = arith.mulf %218, %238 : vector<8x1xf32>
    %248 = arith.subf %246, %247 : vector<8x1xf32>
    %249 = math.absf %238 : vector<8x1xf32>
    %cst_82 = arith.constant 0.000000e+00 : f32
    %250 = vector.broadcast %cst_82 : f32 to vector<8x1xf32>
    %251 = arith.subf %250, %249 : vector<8x1xf32>
    %252 = math.exp %251 : vector<8x1xf32>
    %cst_83 = arith.constant 1.000000e+00 : f32
    %253 = vector.broadcast %cst_83 : f32 to vector<8x1xf32>
    %254 = arith.addf %253, %252 : vector<8x1xf32>
    %255 = math.log %254 : vector<8x1xf32>
    %256 = arith.addf %248, %255 : vector<8x1xf32>
    %257 = vector.shape_cast %256 : vector<8x1xf32> to vector<1x8x1xf32>
    %cst_84 = arith.constant dense<0.000000e+00> : vector<1xf32>
    %258 = vector.multi_reduction <add>, %257, %cst_84 [1, 2] : vector<1x8x1xf32> to vector<1xf32>
    %259 = vector.shape_cast %258 : vector<1xf32> to vector<1x1x1xf32>
    %260 = vector.extract %259[0, 0, 0] : f32 from vector<1x1x1xf32>
    %261 = vector.broadcast %260 : f32 to vector<1x1xf32>
    %cst_85 = arith.constant 8.000000e+00 : f32
    %262 = vector.broadcast %cst_85 : f32 to vector<1x1xf32>
    %263 = arith.divf %261, %262 : vector<1x1xf32>
    %264 = arith.addf %208, %215 : vector<1x1xf32>
    %cst_86 = arith.constant 1.000000e+00 : f32
    %265 = vector.broadcast %cst_86 : f32 to vector<1x1xf32>
    %266 = arith.mulf %265, %263 : vector<1x1xf32>
    %267 = arith.addf %264, %266 : vector<1x1xf32>
    %268 = tpu.iota {dimensions = array<i32: 1>} : vector<8x128xi32>
    %269 = tpu.iota {dimensions = array<i32: 0>} : vector<8x128xi32>
    %c0_i32 = arith.constant 0 : i32
    %270 = vector.broadcast %c0_i32 : i32 to vector<8x128xi32>
    %271 = arith.cmpi eq, %268, %270 : vector<8x128xi32>
    %c1_i32 = arith.constant 1 : i32
    %272 = vector.broadcast %c1_i32 : i32 to vector<8x128xi32>
    %273 = arith.cmpi eq, %268, %272 : vector<8x128xi32>
    %c0_i32_87 = arith.constant 0 : i32
    %274 = vector.broadcast %c0_i32_87 : i32 to vector<8x128xi32>
    %275 = arith.cmpi eq, %269, %274 : vector<8x128xi32>
    %276 = arith.andi %273, %275 : vector<8x128xi1>
    %c2_i32 = arith.constant 2 : i32
    %277 = vector.broadcast %c2_i32 : i32 to vector<8x128xi32>
    %278 = arith.cmpi eq, %268, %277 : vector<8x128xi32>
    %c0_i32_88 = arith.constant 0 : i32
    %279 = vector.broadcast %c0_i32_88 : i32 to vector<8x128xi32>
    %280 = arith.cmpi eq, %269, %279 : vector<8x128xi32>
    %281 = arith.andi %278, %280 : vector<8x128xi1>
    %cst_89 = arith.constant 0.000000e+00 : f32
    %282 = vector.shape_cast %263 : vector<1x1xf32> to vector<1x1xf32>
    %283 = vector.broadcast %282 : vector<1x1xf32> to vector<8x128xf32>
    %284 = vector.broadcast %cst_89 : f32 to vector<8x128xf32>
    %285 = arith.select %281, %283, %284 : vector<8x128xi1>, vector<8x128xf32>
    %286 = vector.shape_cast %267 : vector<1x1xf32> to vector<1x1xf32>
    %287 = vector.broadcast %286 : vector<1x1xf32> to vector<8x128xf32>
    %288 = arith.select %276, %287, %285 : vector<8x128xi1>, vector<8x128xf32>
    %289 = vector.shape_cast %244 : vector<8x1xf32> to vector<8x1xf32>
    %290 = vector.broadcast %289 : vector<8x1xf32> to vector<8x128xf32>
    %291 = arith.select %271, %290, %288 : vector<8x128xi1>, vector<8x128xf32>
    %c0_90 = arith.constant 0 : index
    %c0_91 = arith.constant 0 : index
    %292 = vector.load %arg10[%c0_90, %c0_91] : memref<8x128xf32, #tpu.memory_space<vmem>>, vector<8x128xf32>
    tpu.vector_store %arg10[%c0_90, %c0_91], %291 {strides = array<i32>} : memref<8x128xf32, #tpu.memory_space<vmem>>, vector<8x128xf32>,
    %293 = arith.subf %1, %184 : vector<1x32xf32>
    %cst_92 = arith.constant 2.000000e-03 : f32
    %294 = vector.broadcast %cst_92 : f32 to vector<1x32xf32>
    %295 = arith.mulf %294, %293 : vector<1x32xf32>
    %296 = vector.broadcast %2 : vector<1x32xf32> to vector<8x32xf32>
    %297 = arith.mulf %32, %296 : vector<8x32xf32>
    %cst_93 = arith.constant dense<0.000000e+00> : vector<8xf32>
    %298 = vector.multi_reduction <add>, %297, %cst_93 [1] : vector<8x32xf32> to vector<8xf32>
    %299 = vector.shape_cast %298 : vector<8xf32> to vector<8x1xf32>
    %cst_94 = arith.constant 0.000000e+00 : f32
    %300 = vector.broadcast %cst_94 : f32 to vector<8x1xf32>
    %301 = arith.subf %300, %299 : vector<8x1xf32>
    %302 = math.exp %301 : vector<8x1xf32>
    %cst_95 = arith.constant 1.000000e+00 : f32
    %303 = vector.broadcast %cst_95 : f32 to vector<8x1xf32>
    %304 = arith.addf %303, %302 : vector<8x1xf32>
    %305 = tpu.reciprocal %304 {approx = true} : vector<8x1xf32> -> vector<8x1xf32>
    %306 = vector.broadcast %295 : vector<1x32xf32> to vector<8x32xf32>
    %307 = arith.mulf %32, %306 : vector<8x32xf32>
    %cst_96 = arith.constant dense<0.000000e+00> : vector<8xf32>
    %308 = vector.multi_reduction <add>, %307, %cst_96 [1] : vector<8x32xf32> to vector<8xf32>
    %309 = vector.shape_cast %308 : vector<8xf32> to vector<8x1xf32>
    %310 = arith.subf %305, %17 : vector<8x1xf32>
    %311 = vector.broadcast %310 : vector<8x1xf32> to vector<8x32xf32>
    %312 = vector.broadcast %2 : vector<1x32xf32> to vector<8x32xf32>
    %313 = arith.mulf %311, %312 : vector<8x32xf32>
    %314 = arith.subf %42, %17 : vector<8x1xf32>
    %315 = vector.broadcast %314 : vector<8x1xf32> to vector<8x32xf32>
    %316 = vector.broadcast %295 : vector<1x32xf32> to vector<8x32xf32>
    %317 = arith.mulf %315, %316 : vector<8x32xf32>
    %318 = arith.addf %313, %317 : vector<8x32xf32>
    %319 = arith.mulf %309, %42 : vector<8x1xf32>
    %cst_97 = arith.constant 1.000000e+00 : f32
    %320 = vector.broadcast %cst_97 : f32 to vector<8x1xf32>
    %321 = arith.subf %320, %42 : vector<8x1xf32>
    %322 = arith.mulf %319, %321 : vector<8x1xf32>
    %323 = vector.broadcast %322 : vector<8x1xf32> to vector<8x32xf32>
    %324 = vector.broadcast %0 : vector<1x32xf32> to vector<8x32xf32>
    %325 = arith.mulf %323, %324 : vector<8x32xf32>
    %326 = arith.addf %318, %325 : vector<8x32xf32>
    %cst_98 = arith.constant 1.250000e-01 : f32
    %327 = vector.broadcast %cst_98 : f32 to vector<8x32xf32>
    %328 = arith.mulf %326, %327 : vector<8x32xf32>
    %cst_99 = arith.constant dense<0.000000e+00> : vector<8x256xf32>
    %329 = tpu.matmul %328, %8, %cst_99 {dimension_numbers = #tpu.dot_dimension_numbers<[1], [0], [0], [1], [0, 0, 1, 1], [], []>} : vector<8x32xf32>, vector<32x256xf32>, vector<8x256xf32> -> vector<8x256xf32>
    %330 = arith.mulf %31, %31 : vector<8x256xf32>
    %cst_100 = arith.constant 1.000000e+00 : f32
    %331 = vector.broadcast %cst_100 : f32 to vector<8x256xf32>
    %332 = arith.subf %331, %330 : vector<8x256xf32>
    %333 = arith.mulf %329, %332 : vector<8x256xf32>
    %334 = vector.shape_cast %16 : vector<1x32xf32> to vector<1x32xf32>
    %335 = vector.broadcast %334 : vector<1x32xf32> to vector<8x32xf32>
    %336 = vector.broadcast %2 : vector<1x32xf32> to vector<8x32xf32>
    %337 = arith.mulf %98, %336 : vector<8x32xf32>
    %cst_101 = arith.constant dense<0.000000e+00> : vector<8xf32>
    %338 = vector.multi_reduction <add>, %337, %cst_101 [1] : vector<8x32xf32> to vector<8xf32>
    %339 = vector.shape_cast %338 : vector<8xf32> to vector<8x1xf32>
    %cst_102 = arith.constant 0.000000e+00 : f32
    %340 = vector.broadcast %cst_102 : f32 to vector<8x1xf32>
    %341 = arith.subf %340, %339 : vector<8x1xf32>
    %342 = math.exp %341 : vector<8x1xf32>
    %cst_103 = arith.constant 1.000000e+00 : f32
    %343 = vector.broadcast %cst_103 : f32 to vector<8x1xf32>
    %344 = arith.addf %343, %342 : vector<8x1xf32>
    %345 = tpu.reciprocal %344 {approx = true} : vector<8x1xf32> -> vector<8x1xf32>
    %346 = vector.broadcast %295 : vector<1x32xf32> to vector<8x32xf32>
    %347 = arith.mulf %98, %346 : vector<8x32xf32>
    %cst_104 = arith.constant dense<0.000000e+00> : vector<8xf32>
    %348 = vector.multi_reduction <add>, %347, %cst_104 [1] : vector<8x32xf32> to vector<8xf32>
    %349 = vector.shape_cast %348 : vector<8xf32> to vector<8x1xf32>
    %350 = arith.subf %345, %83 : vector<8x1xf32>
    %351 = vector.broadcast %350 : vector<8x1xf32> to vector<8x32xf32>
    %352 = vector.broadcast %2 : vector<1x32xf32> to vector<8x32xf32>
    %353 = arith.mulf %351, %352 : vector<8x32xf32>
    %354 = arith.subf %108, %83 : vector<8x1xf32>
    %355 = vector.broadcast %354 : vector<8x1xf32> to vector<8x32xf32>
    %356 = vector.broadcast %295 : vector<1x32xf32> to vector<8x32xf32>
    %357 = arith.mulf %355, %356 : vector<8x32xf32>
    %358 = arith.addf %353, %357 : vector<8x32xf32>
    %359 = arith.mulf %349, %108 : vector<8x1xf32>
    %cst_105 = arith.constant 1.000000e+00 : f32
    %360 = vector.broadcast %cst_105 : f32 to vector<8x1xf32>
    %361 = arith.subf %360, %108 : vector<8x1xf32>
    %362 = arith.mulf %359, %361 : vector<8x1xf32>
    %363 = vector.broadcast %362 : vector<8x1xf32> to vector<8x32xf32>
    %364 = vector.broadcast %52 : vector<1x32xf32> to vector<8x32xf32>
    %365 = arith.mulf %363, %364 : vector<8x32xf32>
    %366 = arith.addf %358, %365 : vector<8x32xf32>
    %cst_106 = arith.constant 1.250000e-01 : f32
    %367 = vector.broadcast %cst_106 : f32 to vector<8x32xf32>
    %368 = arith.mulf %366, %367 : vector<8x32xf32>
    %cst_107 = arith.constant dense<0.000000e+00> : vector<8x256xf32>
    %369 = tpu.matmul %368, %8, %cst_107 {dimension_numbers = #tpu.dot_dimension_numbers<[1], [0], [0], [1], [0, 0, 1, 1], [], []>} : vector<8x32xf32>, vector<32x256xf32>, vector<8x256xf32> -> vector<8x256xf32>
    %370 = arith.mulf %97, %97 : vector<8x256xf32>
    %cst_108 = arith.constant 1.000000e+00 : f32
    %371 = vector.broadcast %cst_108 : f32 to vector<8x256xf32>
    %372 = arith.subf %371, %370 : vector<8x256xf32>
    %373 = arith.mulf %369, %372 : vector<8x256xf32>
    %374 = vector.shape_cast %82 : vector<1x32xf32> to vector<1x32xf32>
    %375 = vector.broadcast %374 : vector<1x32xf32> to vector<8x32xf32>
    %376 = vector.broadcast %2 : vector<1x32xf32> to vector<8x32xf32>
    %377 = arith.mulf %164, %376 : vector<8x32xf32>
    %cst_109 = arith.constant dense<0.000000e+00> : vector<8xf32>
    %378 = vector.multi_reduction <add>, %377, %cst_109 [1] : vector<8x32xf32> to vector<8xf32>
    %379 = vector.shape_cast %378 : vector<8xf32> to vector<8x1xf32>
    %cst_110 = arith.constant 0.000000e+00 : f32
    %380 = vector.broadcast %cst_110 : f32 to vector<8x1xf32>
    %381 = arith.subf %380, %379 : vector<8x1xf32>
    %382 = math.exp %381 : vector<8x1xf32>
    %cst_111 = arith.constant 1.000000e+00 : f32
    %383 = vector.broadcast %cst_111 : f32 to vector<8x1xf32>
    %384 = arith.addf %383, %382 : vector<8x1xf32>
    %385 = tpu.reciprocal %384 {approx = true} : vector<8x1xf32> -> vector<8x1xf32>
    %386 = vector.broadcast %295 : vector<1x32xf32> to vector<8x32xf32>
    %387 = arith.mulf %164, %386 : vector<8x32xf32>
    %cst_112 = arith.constant dense<0.000000e+00> : vector<8xf32>
    %388 = vector.multi_reduction <add>, %387, %cst_112 [1] : vector<8x32xf32> to vector<8xf32>
    %389 = vector.shape_cast %388 : vector<8xf32> to vector<8x1xf32>
    %390 = arith.subf %385, %149 : vector<8x1xf32>
    %391 = vector.broadcast %390 : vector<8x1xf32> to vector<8x32xf32>
    %392 = vector.broadcast %2 : vector<1x32xf32> to vector<8x32xf32>
    %393 = arith.mulf %391, %392 : vector<8x32xf32>
    %394 = arith.subf %174, %149 : vector<8x1xf32>
    %395 = vector.broadcast %394 : vector<8x1xf32> to vector<8x32xf32>
    %396 = vector.broadcast %295 : vector<1x32xf32> to vector<8x32xf32>
    %397 = arith.mulf %395, %396 : vector<8x32xf32>
    %398 = arith.addf %393, %397 : vector<8x32xf32>
    %399 = arith.mulf %389, %174 : vector<8x1xf32>
    %cst_113 = arith.constant 1.000000e+00 : f32
    %400 = vector.broadcast %cst_113 : f32 to vector<8x1xf32>
    %401 = arith.subf %400, %174 : vector<8x1xf32>
    %402 = arith.mulf %399, %401 : vector<8x1xf32>
    %403 = vector.broadcast %402 : vector<8x1xf32> to vector<8x32xf32>
    %404 = vector.broadcast %118 : vector<1x32xf32> to vector<8x32xf32>
    %405 = arith.mulf %403, %404 : vector<8x32xf32>
    %406 = arith.addf %398, %405 : vector<8x32xf32>
    %cst_114 = arith.constant 1.250000e-01 : f32
    %407 = vector.broadcast %cst_114 : f32 to vector<8x32xf32>
    %408 = arith.mulf %406, %407 : vector<8x32xf32>
    %cst_115 = arith.constant dense<0.000000e+00> : vector<8x256xf32>
    %409 = tpu.matmul %408, %8, %cst_115 {dimension_numbers = #tpu.dot_dimension_numbers<[1], [0], [0], [1], [0, 0, 1, 1], [], []>} : vector<8x32xf32>, vector<32x256xf32>, vector<8x256xf32> -> vector<8x256xf32>
    %410 = arith.mulf %163, %163 : vector<8x256xf32>
    %cst_116 = arith.constant 1.000000e+00 : f32
    %411 = vector.broadcast %cst_116 : f32 to vector<8x256xf32>
    %412 = arith.subf %411, %410 : vector<8x256xf32>
    %413 = arith.mulf %409, %412 : vector<8x256xf32>
    %414 = vector.shape_cast %148 : vector<1x32xf32> to vector<1x32xf32>
    %415 = vector.broadcast %414 : vector<1x32xf32> to vector<8x32xf32>
    %416 = arith.subf %244, %218 : vector<8x1xf32>
    %cst_117 = arith.constant 1.250000e-01 : f32
    %417 = vector.broadcast %cst_117 : f32 to vector<8x1xf32>
    %418 = arith.mulf %417, %416 : vector<8x1xf32>
    %419 = vector.broadcast %418 : vector<8x1xf32> to vector<8x256xf32>
    %420 = vector.broadcast %9 : vector<1x256xf32> to vector<8x256xf32>
    %421 = arith.mulf %419, %420 : vector<8x256xf32>
    %422 = arith.mulf %232, %232 : vector<8x256xf32>
    %cst_118 = arith.constant 1.000000e+00 : f32
    %423 = vector.broadcast %cst_118 : f32 to vector<8x256xf32>
    %424 = arith.subf %423, %422 : vector<8x256xf32>
    %425 = arith.mulf %421, %424 : vector<8x256xf32>
    %426 = vector.shape_cast %148 : vector<1x32xf32> to vector<1x32xf32>
    %427 = vector.broadcast %426 : vector<1x32xf32> to vector<8x32xf32>
    %428 = tpu.concatenate %333, %373, %413, %425 in 0 : vector<8x256xf32>, vector<8x256xf32>, vector<8x256xf32>, vector<8x256xf32> -> vector<32x256xf32>
    %429 = tpu.concatenate %335, %375, %415, %427 in 0 : vector<8x32xf32>, vector<8x32xf32>, vector<8x32xf32>, vector<8x32xf32> -> vector<32x32xf32>
    %c0_119 = arith.constant 0 : index
    %c0_120 = arith.constant 0 : index
    %430 = vector.load %arg1[%c0_119, %c0_120] : memref<32x128xf32, #tpu.memory_space<vmem>>, vector<32x2xf32>
    %cst_121 = arith.constant dense<0.000000e+00> : vector<32x256xf32>
    %431 = tpu.matmul %429, %428, %cst_121 {dimension_numbers = #tpu.dot_dimension_numbers<[0], [0], [1], [1], [0, 1, 1, 1], [], []>} : vector<32x32xf32>, vector<32x256xf32>, vector<32x256xf32> -> vector<32x256xf32>
    %432 = vector.broadcast %1 : vector<1x32xf32> to vector<32x32xf32>
    %433 = arith.subf %429, %432 : vector<32x32xf32>
    %cst_122 = arith.constant dense<0.000000e+00> : vector<32x256xf32>
    %434 = tpu.matmul %433, %428, %cst_122 {dimension_numbers = #tpu.dot_dimension_numbers<[0], [0], [1], [1], [0, 1, 1, 1], [], []>} : vector<32x32xf32>, vector<32x256xf32>, vector<32x256xf32> -> vector<32x256xf32>
    %cst_123 = arith.constant dense<0.000000e+00> : vector<2x256xf32>
    %435 = tpu.matmul %430, %428, %cst_123 {dimension_numbers = #tpu.dot_dimension_numbers<[0], [0], [1], [1], [0, 1, 1, 1], [], []>} : vector<32x2xf32>, vector<32x256xf32>, vector<2x256xf32> -> vector<2x256xf32>
    %436 = vector.extract_strided_slice %435 {offsets = [0, 0], sizes = [1, 256], strides = [1, 1]} : vector<2x256xf32> to vector<1x256xf32>
    %437 = vector.extract_strided_slice %435 {offsets = [1, 0], sizes = [1, 256], strides = [1, 1]} : vector<2x256xf32> to vector<1x256xf32>
    %438 = arith.addf %436, %437 : vector<1x256xf32>
    %c0_124 = arith.constant 0 : index
    %c0_125 = arith.constant 0 : index
    %439 = vector.load %arg8[%c0_124, %c0_125] : memref<67x256xf32, #tpu.memory_space<vmem>>, vector<32x256xf32>
    tpu.vector_store %arg8[%c0_124, %c0_125], %431 {strides = array<i32>} : memref<67x256xf32, #tpu.memory_space<vmem>>, vector<32x256xf32>,
    %c32 = arith.constant 32 : index
    %c0_126 = arith.constant 0 : index
    %440 = vector.load %arg8[%c32, %c0_126] : memref<67x256xf32, #tpu.memory_space<vmem>>, vector<32x256xf32>
    tpu.vector_store %arg8[%c32, %c0_126], %434 {strides = array<i32>} : memref<67x256xf32, #tpu.memory_space<vmem>>, vector<32x256xf32>,
    %c64 = arith.constant 64 : index
    %c0_127 = arith.constant 0 : index
    %441 = vector.load %arg8[%c64, %c0_127] : memref<67x256xf32, #tpu.memory_space<vmem>>, vector<2x256xf32>
    tpu.vector_store %arg8[%c64, %c0_127], %435 {strides = array<i32>} : memref<67x256xf32, #tpu.memory_space<vmem>>, vector<2x256xf32>,
    %c66 = arith.constant 66 : index
    %c0_128 = arith.constant 0 : index
    %442 = vector.load %arg8[%c66, %c0_128] : memref<67x256xf32, #tpu.memory_space<vmem>>, vector<1x256xf32>
    tpu.vector_store %arg8[%c66, %c0_128], %438 {strides = array<i32>} : memref<67x256xf32, #tpu.memory_space<vmem>>, vector<1x256xf32>,
    return
  }
}

</mosaic_0001>

<bundles_post_ra>
// kernel: mul.20
= control target key start
LH: loop header
LB: loop body
LE: loop exit
PB: predicated region body
PF: predicated region fallthrough
CT: control target
= control target key end

     0   :  { %s82_s0 = inlined_call_operand.vmem [shape: f32[2,2], index: 0, kind: input, shape index: {}]   ;;  %s83_s1 = inlined_call_operand.vmem [shape: f32[2,2,16,16], index: 1, kind: output, shape index: {}]  }
   0x1   :  { %v14_v0 = vld [vmem:[%s82_s0] ss:$0 sm:$0xff]  ;;  %v36_v1 = vld [vmem:[%s82_s0 + $0x1] ss:$0 sm:$0xff] }
   0x2   :  { %15 = vbcast.lane.b32.xlu1 %v14_v0, 1  ;;  %5 = vbcast.lane.b32.xlu0 %v14_v0, 0 }
   0x6   :  { %21 = vbcast.lane.b32.xlu1 %v36_v1, 1  ;;  %10 = vbcast.lane.b32.xlu0 %v36_v1, 0 }
  0x74   :  { %v16_v2 = vpop.permute.xlu1 %15  ;;  %v6_v3 = vpop.permute.xlu0 %5 }
  0x75   :  { %35 = vst [vmem:[%s83_s1 + $0x10] sm:$0xff] %v16_v2  ;;  %40 = vst [vmem:[%s83_s1 + $0x18] sm:$0xff] %v16_v2 }
  0x76   :  { %7 = vst [vmem:[%s83_s1] sm:$0xff] %v6_v3  ;;  %38 = vst [vmem:[%s83_s1 + $0x8] sm:$0xff] %v6_v3 }
  0x78   :  { %v22_v4 = vpop.permute.xlu1 %21  ;;  %v11_v5 = vpop.permute.xlu0 %10 }
  0x79   :  { %37 = vst [vmem:[%s83_s1 + $0x30] sm:$0xff] %v22_v4  ;;  %41 = vst [vmem:[%s83_s1 + $0x38] sm:$0xff] %v22_v4 }
  0x7a   :  { %34 = vst [vmem:[%s83_s1 + $0x20] sm:$0xff] %v11_v5  ;;  %39 = vst [vmem:[%s83_s1 + $0x28] sm:$0xff] %v11_v5 }

// kernel: sub.3
= control target key start
LH: loop header
LB: loop body
LE: loop exit
PB: predicated region body
PF: predicated region fallthrough
CT: control target
= control target key end

     0   :  { %s56_s0 = inlined_call_operand.vmem [shape: f32[1,256], index: 0, kind: input, shape index: {}]   ;;  %s57_s1 = inlined_call_operand.vmem [shape: f32[1,256], index: 1, kind: input, shape index: {}]   ;;  %s58_s2 = inlined_call_operand.vmem [shape: f32[1,256], index: 2, kind: output, shape index: {}]  }
   0x1   :  { %v3_v0 = vld [vmem:[%s56_s0] sm:$0x1]  ;;  %v20_v2 = vld [vmem:[%s56_s0 + $0x1] sm:$0x1] }
   0x2   :  { %v4_v1 = vld [vmem:[%s57_s1] sm:$0x1]  ;;  %v21_v4 = vld [vmem:[%s57_s1 + $0x1] sm:$0x1] }
   0x3   :  { %v7_v3 = vsub.f32 %v3_v0, %v4_v1  ;;  %v16_v5 = vsub.f32 %v20_v2, %v21_v4 }
   0x5   :  { %9 = vst [vmem:[%s58_s2] sm:$0x1] %v7_v3  ;;  %22 = vst [vmem:[%s58_s2 + $0x1] sm:$0x1] %v16_v5 }

// kernel: unrolled_optimizer_forward.1
= control target key start
LH: loop header
LB: loop body
LE: loop exit
PB: predicated region body
PF: predicated region fallthrough
CT: control target
= control target key end

     0   :  { %vm89_vm0 = vcmask 253952   ;;  %v2109_v6 = vmov 0.0   ;;  %v2110_v16 = vmov 1   ;;  %v2111_v23 = vmov 0   ;;  %s2112_s19 = smov 127   ;;  %s2114_s22 = smov 1   ;;  %s2894_s0 = inlined_call_operand.vmem [shape: f32[3,32], index: 0, kind: input, shape index: {}]   ;;  %s2895_s2 = inlined_call_operand.vmem [shape: f32[32,256], index: 2, kind: input, shape index: {}]   ;;  %s2896_s1 = inlined_call_operand.vmem [shape: f32[32,128], index: 1, kind: input, shape index: {}]   ;;  %s2897_s5 = inlined_call_operand.vmem [shape: f32[256,32], index: 5, kind: input, shape index: {}]   ;;  %s2898_s4 = inlined_call_operand.vmem [shape: f32[1,256], index: 4, kind: input, shape index: {}]   ;;  %s2899_s3 = inlined_call_operand.vmem [shape: f32[2,256], index: 3, kind: input, shape index: {}]   ;;  %s2900_s6 = inlined_call_operand.vmem [shape: f32[32,256], index: 6, kind: input, shape index: {}]   ;;  %s2901_s7 = inlined_call_operand.vmem [shape: f32[1,256], index: 7, kind: input, shape index: {}]   ;;  %s2902_s9 = inlined_call_operand.vmem [shape: f32[8,256], index: 9, kind: output, shape index: {1}]   ;;  %s2903_s8 = inlined_call_operand.vmem [shape: f32[67,256], index: 8, kind: output, shape index: {0}]   ;;  %s2904_s10 = inlined_call_operand.vmem [shape: f32[8,128], index: 10, kind: output, shape index: {2}]  }
   0x1   :  { %v2175_v0 = vld [vmem:[%s2894_s0] sm:$0x1]  ;;  %v36_v3 = vld [vmem:[%s2895_s2 + $0x8] sm:$0xff]  ;;  %v38_v4 = vld [vmem:[%s2895_s2 + $0x18] sm:$0xff]  ;;  %175 = vmatprep.mubr.f32.mxu0 %v2109_v6  ;;  %2037 = vset.pattern.permute.xlu0 %v2110_v16  ;;  %vm107_vm3 = vcmask 261120   ;;  %vm347_vm10 = vcmask 7168  }
   0x2   :  { %v88_v1 = vmul.f32 %v2175_v0, %v2175_v0  ;;  %v35_v5 = vld [vmem:[%s2895_s2] sm:$0xff]  ;;  %v2190_v7 = vpack.c.bf16 %v38_v4, %v36_v3  ;;  %v37_v8 = vld [vmem:[%s2895_s2 + $0x10] sm:$0xff]  ;;  %v40_v9 = vld [vmem:[%s2895_s2 + $0x28] sm:$0xff]  ;;  %2038 = vset.pattern.permute.xlu1 %v2110_v16 }
   0x3   :  { %v42_v10 = vld [vmem:[%s2895_s2 + $0x38] sm:$0xff]  ;;  %v2201_v11 = vpack.c.bf16 %v37_v8, %v35_v5  ;;  %v39_v13 = vld [vmem:[%s2895_s2 + $0x20] sm:$0xff]  ;;  %v41_v14 = vld [vmem:[%s2895_s2 + $0x30] sm:$0xff] }
   0x4   :  { %v90_v2 = vsel %vm89_vm0, %v88_v1, 0.0  ;;  %v2203_v12 = vpack.c.bf16 %v42_v10, %v40_v9  ;;  %1852 = vmatprep.subr.bf16.mxu0 %v2190_v7  ;;  %v2213_v15 = vpack.c.bf16 %v41_v14, %v39_v13  ;;  %v2221_v17 = vld [vmem:[%s2896_s1] sm:$0xff]  ;;  %v2226_v18 = vld [vmem:[%s2896_s1 + $0x8] sm:$0xff]  ;;  %v65_v27 = vld [vmem:[%s2897_s5 + $0x90] sm:$0xff]  ;;  %v97_v14 = vlaneseq }
   0x5   :  { %91 = vadd.xlane.f32.xlu0 %v90_v2  ;;  %1854 = vmatpush1.bf16.msra.mxu0 %v2201_v11  ;;  %v63_v19 = vld [vmem:[%s2897_s5 + $0x80] sm:$0xff]  ;;  %vm182_vm1 = vcmp.gt.f32.partialorder %v2221_v17, 0.5  ;;  %vm443_vm2 = vcmp.gt.f32.partialorder %v2226_v18, 0.5  ;;  %v64_v20 = vld [vmem:[%s2897_s5 + $0x88] sm:$0xff]  ;;  %v66_v28 = vld [vmem:[%s2897_s5 + $0x98] sm:$0xff] }
   0x6   :  { %1856 = vmatprep.subr.bf16.mxu0 %v2203_v12  ;;  %v47_v21 = vld [vmem:[%s2897_s5] sm:$0xff]  ;;  %v48_v22 = vld [vmem:[%s2897_s5 + $0x8] sm:$0xff]  ;;  %v183_v24 = vsel %vm182_vm1, 1, %v2111_v23  ;;  %v2243_v25 = vpack.c.bf16 %v64_v20, %v63_v19  ;;  %v49_v29 = vld [vmem:[%s2897_s5 + $0x10] sm:$0xff]  ;;  %v2256_v30 = vpack.c.bf16 %v66_v28, %v65_v27  ;;  %v444_v34 = vsel %vm443_vm2, 1, %v2111_v23 }
   0x7   :  { %v2245_v26 = vpack.c.bf16 %v48_v22, %v47_v21  ;;  %v50_v31 = vld [vmem:[%s2897_s5 + $0x18] sm:$0xff]  ;;  %v67_v32 = vld [vmem:[%s2897_s5 + $0xa0] sm:$0xff]  ;;  %v68_v33 = vld [vmem:[%s2897_s5 + $0xa8] sm:$0xff]  ;;  %v2390_v16 = vshrl.u32 %v97_v14, 7  ;;  %vm1711_vm11 = vcmp.lt.s32.totalorder %v97_v14, 256 }
   0x8   :  { %1860 = vmatprep.subr.bf16.mxu1 %v2243_v25  ;;  %v2272_v35 = vpack.c.bf16 %v50_v31, %v49_v29  ;;  %v2275_v36 = vpack.c.bf16 %v68_v33, %v67_v32  ;;  %v51_v37 = vld [vmem:[%s2897_s5 + $0x20] sm:$0xff]  ;;  %v52_v38 = vld [vmem:[%s2897_s5 + $0x28] sm:$0xff]  ;;  %v69_v43 = vld [vmem:[%s2897_s5 + $0xb0] sm:$0xff] }
   0x9   :  { %1858 = vmatpush1.bf16.msra.mxu0 %v2213_v15  ;;  %1862 = vmatpush3.bf16.msra.mxu1 %v2245_v26  ;;  %v2284_v39 = vpack.c.bf16 %v52_v38, %v51_v37  ;;  %v70_v44 = vld [vmem:[%s2897_s5 + $0xb8] sm:$0xff]  ;;  %v53_v46 = vld [vmem:[%s2897_s5 + $0x30] sm:$0xff]  ;;  %v71_v49 = vld [vmem:[%s2897_s5 + $0xc0] sm:$0xff]  ;;  %v2393_v19 = vsub.s32 0, %v2390_v16  ;;  %v2396_v20 = vsub.s32 1, %v2390_v16  ;;  %vm921_vm12 = vcmp.eq.s32.totalorder %v2390_v16, 0 }
   0xa   :  { %1892 = vmatprep.subr.bf16.mxu0 %v2190_v7  ;;  %1864 = vmatprep.subr.bf16.mxu1 %v2256_v30  ;;  %v2304_v45 = vpack.c.bf16 %v70_v44, %v69_v43  ;;  %v54_v47 = vld [vmem:[%s2897_s5 + $0x38] sm:$0xff]  ;;  %v72_v50 = vld [vmem:[%s2897_s5 + $0xc8] sm:$0xff]  ;;  %v55_v52 = vld [vmem:[%s2897_s5 + $0x40] sm:$0xff] }
   0xb   :  { %v2312_v48 = vpack.c.bf16 %v54_v47, %v53_v46  ;;  %v2322_v51 = vpack.c.bf16 %v72_v50, %v71_v49  ;;  %v56_v53 = vld [vmem:[%s2897_s5 + $0x48] sm:$0xff]  ;;  %v73_v55 = vld [vmem:[%s2897_s5 + $0xd0] sm:$0xff]  ;;  %v74_v56 = vld [vmem:[%s2897_s5 + $0xd8] sm:$0xff] }
   0xc   :  { %v2330_v54 = vpack.c.bf16 %v56_v53, %v55_v52  ;;  %v2340_v57 = vpack.c.bf16 %v74_v56, %v73_v55  ;;  %v57_v58 = vld [vmem:[%s2897_s5 + $0x50] sm:$0xff]  ;;  %v58_v59 = vld [vmem:[%s2897_s5 + $0x58] sm:$0xff]  ;;  %v75_v61 = vld [vmem:[%s2897_s5 + $0xe0] sm:$0xff]  ;;  %v2446_v55 = vrot.slane %v2175_v0, %v2393_v19 }
   0xd   :  { %1866 = vmatpush3.bf16.msra.mxu1 %v2272_v35  ;;  %v2348_v60 = vpack.c.bf16 %v58_v59, %v57_v58  ;;  %v76_v62 = vld [vmem:[%s2897_s5 + $0xe8] sm:$0xff]  ;;  %v59_v63 = vld [vmem:[%s2897_s5 + $0x60] sm:$0xff]  ;;  %v77_v3 = vld [vmem:[%s2897_s5 + $0xf0] sm:$0xff] }
   0xe   :  { %1868 = vmatprep.subr.bf16.mxu1 %v2275_v36  ;;  %v2361_v1 = vpack.c.bf16 %v76_v62, %v75_v61  ;;  %v60_v2 = vld [vmem:[%s2897_s5 + $0x68] sm:$0xff]  ;;  %v78_v4 = vld [vmem:[%s2897_s5 + $0xf8] sm:$0xff]  ;;  %v61_v9 = vld [vmem:[%s2897_s5 + $0x70] sm:$0xff] }
   0xf   :  { %v2372_v5 = vpack.c.bf16 %v60_v2, %v59_v63  ;;  %v2374_v8 = vpack.c.bf16 %v78_v4, %v77_v3  ;;  %v62_v10 = vld [vmem:[%s2897_s5 + $0x78] sm:$0xff]  ;;  %v46_v21 = vld [vmem:[%s2898_s4] sm:$0x3] }
  0x10   :  { %v2384_v13 = vpack.c.bf16 %v62_v10, %v61_v9  ;;  %v43_v22 = vld [vmem:[%s2899_s3] ss:$2 sm:$0x3]  ;;  %v2417_v31 = vrot.slane %v46_v21, %v2396_v20 }
  0x11   :  { %1870 = vmatpush3.bf16.msra.mxu1 %v2284_v39  ;;  %v2414_v28 = vrot.slane %v43_v22, %v2393_v19  ;;  %v2423_v33 = vrot.slane %v43_v22, %v2396_v20 }
  0x12   :  { %1872 = vmatprep.subr.bf16.mxu1 %v2304_v45 }
  0x15   :  { %1874 = vmatpush3.bf16.msra.mxu1 %v2312_v48 }
  0x16   :  { %1876 = vmatprep.subr.bf16.mxu1 %v2322_v51 }
  0x19   :  { %1878 = vmatpush3.bf16.msra.mxu1 %v2330_v54 }
  0x1a   :  { %1880 = vmatprep.subr.bf16.mxu1 %v2340_v57 }
  0x1b   :  { %185 = vperm.xlu0 %2037, %v183_v24   ;;  %v2408_v24 = vrot.slane %v46_v21, %v2393_v19 }
  0x1d   :  { %1882 = vmatpush3.bf16.msra.mxu1 %v2348_v60 }
  0x1e   :  { %1884 = vmatprep.subr.bf16.mxu1 %v2361_v1 }
  0x1f   :  { %446 = vperm.xlu0 %2037, %v444_v34  }
  0x21   :  { %1886 = vmatpush3.bf16.msra.mxu1 %v2372_v5 }
  0x22   :  { %1888 = vmatprep.subr.bf16.mxu1 %v2374_v8 }
  0x25   :  { %1890 = vmatpush3.bf16.msra.mxu1 %v2384_v13 }
  0x26   :  { %1932 = vmatprep.subr.bf16.mxu1 %v2190_v7  ;;  %v1728_v7 = vld [vmem:[%s2899_s3 + $0x1] ss:$2 sm:$0x3] }
  0x27   :  { %v2411_v27 = vrot.slane %v1728_v7, %v2393_v19  ;;  %v2420_v32 = vrot.slane %v1728_v7, %v2396_v20 }
  0x92   :  { %v92_v40 = vpop.xlane.xlu0 %91 }
  0x93   :  { %2041 = vrsqrt.f32 %v92_v40 }
  0x9a   :  { %v186_v29 = vpop.permute.xlu0 %185 }
  0x9b   :  { %vm187_vm4 = vcmp.eq.s32.totalorder %v186_v29, 1 }
  0x9c   :  { %v210_v40 = vsel %vm187_vm4, %v2411_v27, %v2414_v28  ;;  %v211_v43 = vsel %vm187_vm4, %v2420_v32, %v2423_v33 }
  0x9d   :  { %v2042_v41 = vpop.eup %2041 }
  0x9e   :  { %v2289_v42 = vmul.f32 %v2042_v41, %v2175_v0 }
  0xa0   :  { %1729 = vmatmul.mubr.msk.f32.vlgmr.msra.gmra.mrb[0].mxu0 %vm107_vm3, %v2289_v42 }
  0xa1   :  { %1894 = vmatpush1.bf16.msra.mxu0 %v2201_v11  ;;  %436 = vmatprep.mubr.f32.mxu0 %v2109_v6 }
  0xa2   :  { %1896 = vmatprep.subr.bf16.mxu0 %v2203_v12 }
  0xa5   :  { %1898 = vmatpush1.bf16.msra.mxu0 %v2213_v15 }
  0xa6   :  { %1900 = vmatprep.subr.bf16.mxu0 %v2243_v25 }
 0x173   :  { %v177_v34 = vpop.f32.mrb[0].mxu0 }
 0x174   :  { %v178_v37 = vadd.f32 %v177_v34, %v2408_v24  ;;  %v179_v38 = vpop.f32.mrb[1].mxu0 }
 0x175   :  { %v180_v41 = vadd.f32 %v179_v38, %v2417_v31 }
 0x176   :  { %v215_v44 = vrot.slane %v178_v37, %v2393_v19 }
 0x177   :  { %v219_v46 = vrot.slane %v180_v41, %v2393_v19 }
 0x178   :  { %v220_v47 = vadd.f32 %v215_v44, %v210_v40 }
 0x179   :  { %v221_v49 = vadd.f32 %v219_v46, %v211_v43 }
 0x17b   :  { %2043 = vtanh.f32 %v221_v49 }
 0x17c   :  { %2045 = vtanh.f32 %v220_v47 }
 0x185   :  { %v2433_v50 = vpop.eup %2043 }
 0x186   :  { %v2435_v52 = vpop.eup %2045  ;;  %288 = vmatprep.mubr.f32.mxu1 %v2433_v50 }
 0x187   :  { %289 = vmatmul.mubr.f32.vlgmr.msra.gmra.mrb[0].mxu1 %v2435_v52 }
 0x188   :  { %1934 = vmatpush1.bf16.msra.mxu1 %v2201_v11  ;;  %669 = vmatprep.mubr.f32.mxu1 %v2109_v6 }
 0x189   :  { %1936 = vmatprep.subr.bf16.mxu1 %v2203_v12 }
 0x18c   :  { %1938 = vmatpush1.bf16.msra.mxu1 %v2213_v15 }
 0x18d   :  { %1940 = vmatprep.subr.bf16.mxu1 %v2243_v25 }
 0x25a   :  { %v1778_v53 = vpop.f32.mrb[0].mxu1 }
 0x25b   :  { %v1779_v56 = vpop.f32.mrb[1].mxu1 }
 0x25c   :  { %v2448_v58 = vadd.f32 %v1779_v56, %v1778_v53 }
 0x25e   :  { %v298_v59 = vmul.f32 %v2448_v58, %v2446_v55 }
 0x260   :  { %v299_v11 = vsel %vm107_vm3, %v298_v59, 0.0 }
 0x261   :  { %300 = vadd.xlane.f32.xlu1 %v299_v11 }
 0x2ee   :  { %v301_v61 = vpop.xlane.xlu1 %300 }
 0x2ef   :  { %v302_v12 = vsub.f32 0.0, %v301_v61 }
 0x2f1   :  { %v303_v62 = vmul.f32 1.442695, %v302_v12 }
 0x2f3   :  { %2047 = vpow2.f32 %v303_v62 }
 0x2fd   :  { %v2048_v15 = vpop.eup %2047 }
 0x2fe   :  { %v305_v25 = vadd.f32 1.0, %v2048_v15 }
 0x300   :  { %2049 = vrcp.f32 %v305_v25 }
 0x30a   :  { %v2453_v63 = vpop.eup %2049 }
 0x30b   :  { %v307_v2 = vsub.f32 %v2453_v63, %v2221_v17 }
 0x30d   :  { %310 = vperm.xlu1 %2038, %v307_v2  }
 0x38c   :  { %v2457_v3 = vpop.permute.xlu1 %310 }
 0x38d   :  { %v313_v4 = vmul.f32 %v2448_v58, %v2457_v3 }
 0x38f   :  { %v314_v9 = vsel %vm107_vm3, %v313_v4, 0.0 }
 0x390   :  { %v315_v10 = vrot.slane %v314_v9, 4 }
 0x392   :  { %v316_v21 = vadd.f32 %v315_v10, %v314_v9 }
 0x394   :  { %v317_v22 = vrot.slane %v316_v21, 2 }
 0x396   :  { %v318_v7 = vadd.f32 %v317_v22, %v316_v21 }
 0x398   :  { %v319_v29 = vrot.slane %v318_v7, 1 }
 0x39a   :  { %v320_v34 = vadd.f32 %v319_v29, %v318_v7 }
 0x39c   :  { %v321_v37 = vmul.f32 0.125, %v320_v34  ;;  %v2515_v34 = vld [vmem:[%s2896_s1 + $0x10] sm:$0xff] }
 0x39d   :  { %vm676_vm6 = vcmp.gt.f32.partialorder %v2515_v34, 0.5 }
 0x39e   :  { %v322_v38 = vmul.f32 0.001, %v321_v37  ;;  %v677_v37 = vsel %vm676_vm6, 1, %v2111_v23 }
 0x3a0   :  { %v2463_v40 = vsub.f32 %v2175_v0, %v322_v38  ;;  %v447_v0 = vpop.permute.xlu0 %446 }
 0x3a1   :  { %vm448_vm5 = vcmp.eq.s32.totalorder %v447_v0, 1 }
 0x3a2   :  { %v362_v41 = vmul.f32 %v2463_v40, %v2463_v40  ;;  %v449_v61 = vsel %vm448_vm5, %v2411_v27, %v2414_v28  ;;  %v450_v62 = vsel %vm448_vm5, %v2420_v32, %v2423_v33  ;;  %v2507_v22 = vrot.slane %v2463_v40, %v2393_v19 }
 0x3a4   :  { %v363_v43 = vsel %vm89_vm0, %v362_v41, 0.0 }
 0x3a5   :  { %364 = vadd.xlane.f32.xlu1 %v363_v43 }
 0x432   :  { %v365_v44 = vpop.xlane.xlu1 %364 }
 0x433   :  { %2051 = vrsqrt.f32 %v365_v44 }
 0x43d   :  { %v2052_v46 = vpop.eup %2051 }
 0x43e   :  { %v2469_v47 = vmul.f32 %v2052_v46, %v2463_v40 }
 0x440   :  { %1731 = vmatmul.mubr.msk.f32.vlgmr.msra.gmra.mrb[2].mxu0 %vm107_vm3, %v2469_v47 }
 0x441   :  { %1902 = vmatpush3.bf16.msra.mxu0 %v2245_v26 }
 0x442   :  { %1904 = vmatprep.subr.bf16.mxu0 %v2256_v30 }
 0x445   :  { %1906 = vmatpush3.bf16.msra.mxu0 %v2272_v35 }
 0x446   :  { %1908 = vmatprep.subr.bf16.mxu0 %v2275_v36 }
 0x449   :  { %1910 = vmatpush3.bf16.msra.mxu0 %v2284_v39 }
 0x44a   :  { %1912 = vmatprep.subr.bf16.mxu0 %v2304_v45 }
 0x44d   :  { %1914 = vmatpush3.bf16.msra.mxu0 %v2312_v48 }
 0x44e   :  { %1916 = vmatprep.subr.bf16.mxu0 %v2322_v51 }
 0x451   :  { %1918 = vmatpush3.bf16.msra.mxu0 %v2330_v54 }
 0x452   :  { %1920 = vmatprep.subr.bf16.mxu0 %v2340_v57 }
 0x455   :  { %1922 = vmatpush3.bf16.msra.mxu0 %v2348_v60 }
 0x456   :  { %1924 = vmatprep.subr.bf16.mxu0 %v2361_v1 }
 0x459   :  { %1926 = vmatpush3.bf16.msra.mxu0 %v2372_v5 }
 0x45a   :  { %1928 = vmatprep.subr.bf16.mxu0 %v2374_v8 }
 0x45d   :  { %1930 = vmatpush3.bf16.msra.mxu0 %v2384_v13 }
 0x513   :  { %v438_v49 = vpop.f32.mrb[2].mxu0 }
 0x514   :  { %v439_v53 = vadd.f32 %v438_v49, %v2408_v24  ;;  %v440_v56 = vpop.f32.mrb[3].mxu0 }
 0x515   :  { %v441_v59 = vadd.f32 %v440_v56, %v2417_v31 }
 0x516   :  { %v454_v11 = vrot.slane %v439_v53, %v2393_v19 }
 0x517   :  { %v458_v12 = vrot.slane %v441_v59, %v2393_v19 }
 0x518   :  { %v459_v15 = vadd.f32 %v454_v11, %v449_v61 }
 0x519   :  { %v460_v25 = vadd.f32 %v458_v12, %v450_v62 }
 0x51b   :  { %2053 = vtanh.f32 %v460_v25 }
 0x51c   :  { %2055 = vtanh.f32 %v459_v15 }
 0x525   :  { %v2496_v2 = vpop.eup %2053 }
 0x526   :  { %v2498_v4 = vpop.eup %2055  ;;  %527 = vmatprep.mubr.f32.mxu0 %v2496_v2 }
 0x527   :  { %528 = vmatmul.mubr.f32.vlgmr.msra.gmra.mrb[4].mxu0 %v2498_v4 }
 0x528   :  { %1030 = vmatprep.mubr.f32.mxu0 %v2109_v6 }
 0x5fa   :  { %v1813_v9 = vpop.f32.mrb[4].mxu0 }
 0x5fb   :  { %v1814_v10 = vpop.f32.mrb[5].mxu0 }
 0x5fc   :  { %v2503_v21 = vadd.f32 %v1814_v10, %v1813_v9 }
 0x5fe   :  { %v537_v7 = vmul.f32 %v2503_v21, %v2507_v22 }
 0x600   :  { %v538_v29 = vsel %vm107_vm3, %v537_v7, 0.0 }
 0x601   :  { %539 = vadd.xlane.f32.xlu0 %v538_v29 }
 0x617   :  { %679 = vperm.xlu0 %2037, %v677_v37  }
 0x68e   :  { %v540_v38 = vpop.xlane.xlu0 %539 }
 0x68f   :  { %v541_v41 = vsub.f32 0.0, %v540_v38 }
 0x691   :  { %v542_v43 = vmul.f32 1.442695, %v541_v41 }
 0x693   :  { %2057 = vpow2.f32 %v542_v43 }
 0x69d   :  { %v2058_v44 = vpop.eup %2057 }
 0x69e   :  { %v544_v46 = vadd.f32 1.0, %v2058_v44  ;;  %v2583_v44 = vld [vmem:[%s2894_s0 + $0x2] ss:$0 sm:$0xff] }
 0x6a0   :  { %2059 = vrcp.f32 %v544_v46 }
 0x6aa   :  { %v2519_v0 = vpop.eup %2059 }
 0x6ab   :  { %v546_v49 = vsub.f32 %v2519_v0, %v2226_v18 }
 0x6ad   :  { %549 = vperm.xlu1 %2038, %v546_v49   ;;  %v563_v49 = vmul.f32 %v2503_v21, %v2583_v44 }
 0x72c   :  { %v2523_v53 = vpop.permute.xlu1 %549 }
 0x72d   :  { %v552_v56 = vmul.f32 %v2503_v21, %v2523_v53 }
 0x72f   :  { %v553_v59 = vsel %vm107_vm3, %v552_v56, 0.0  ;;  %v564_v56 = vsel %vm107_vm3, %v563_v49, 0.0  ;;  %v2606_v49 = vld [vmem:[%s2894_s0 + $0x1] sm:$0x1] }
 0x730   :  { %v554_v11 = vrot.slane %v553_v59, 4 }
 0x732   :  { %v555_v61 = vadd.f32 %v554_v11, %v553_v59 }
 0x734   :  { %v556_v12 = vrot.slane %v555_v61, 2 }
 0x736   :  { %v557_v62 = vadd.f32 %v556_v12, %v555_v61 }
 0x738   :  { %v558_v15 = vrot.slane %v557_v62, 1 }
 0x73a   :  { %v559_v25 = vadd.f32 %v558_v15, %v557_v62 }
 0x73c   :  { %v560_v9 = vmul.f32 0.125, %v559_v25 }
 0x73e   :  { %v561_v10 = vmul.f32 0.001, %v560_v9 }
 0x740   :  { %v2529_v7 = vsub.f32 %v2463_v40, %v561_v10 }
 0x742   :  { %v595_v29 = vmul.f32 %v2529_v7, %v2529_v7 }
 0x744   :  { %v596_v37 = vsel %vm89_vm0, %v595_v29, 0.0  ;;  %v328_v29 = vmul.f32 %v2448_v58, %v2583_v44 }
 0x745   :  { %597 = vadd.xlane.f32.xlu1 %v596_v37 }
 0x746   :  { %v329_v37 = vsel %vm107_vm3, %v328_v29, 0.0 }
 0x7d2   :  { %v598_v38 = vpop.xlane.xlu1 %597 }
 0x7d3   :  { %2061 = vrsqrt.f32 %v598_v38 }
 0x7dd   :  { %v2062_v41 = vpop.eup %2061 }
 0x7de   :  { %v2535_v43 = vmul.f32 %v2062_v41, %v2529_v7 }
 0x7e0   :  { %1732 = vmatmul.mubr.msk.f32.vlgmr.msra.gmra.mrb[2].mxu1 %vm107_vm3, %v2535_v43 }
 0x7e1   :  { %1942 = vmatpush3.bf16.msra.mxu1 %v2245_v26  ;;  %v680_v26 = vpop.permute.xlu0 %679 }
 0x7e2   :  { %1944 = vmatprep.subr.bf16.mxu1 %v2256_v30  ;;  %vm681_vm7 = vcmp.eq.s32.totalorder %v680_v26, 1 }
 0x7e5   :  { %1946 = vmatpush3.bf16.msra.mxu1 %v2272_v35 }
 0x7e6   :  { %1948 = vmatprep.subr.bf16.mxu1 %v2275_v36 }
 0x7e9   :  { %1950 = vmatpush3.bf16.msra.mxu1 %v2284_v39 }
 0x7ea   :  { %1952 = vmatprep.subr.bf16.mxu1 %v2304_v45 }
 0x7ed   :  { %1954 = vmatpush3.bf16.msra.mxu1 %v2312_v48  ;;  %v682_v48 = vsel %vm681_vm7, %v2411_v27, %v2414_v28 }
 0x7ee   :  { %1956 = vmatprep.subr.bf16.mxu1 %v2322_v51 }
 0x7f1   :  { %1958 = vmatpush3.bf16.msra.mxu1 %v2330_v54  ;;  %v683_v54 = vsel %vm681_vm7, %v2420_v32, %v2423_v33 }
 0x7f2   :  { %1960 = vmatprep.subr.bf16.mxu1 %v2340_v57 }
 0x7f5   :  { %1962 = vmatpush3.bf16.msra.mxu1 %v2348_v60 }
 0x7f6   :  { %1964 = vmatprep.subr.bf16.mxu1 %v2361_v1 }
 0x7f9   :  { %1966 = vmatpush3.bf16.msra.mxu1 %v2372_v5 }
 0x7fa   :  { %1968 = vmatprep.subr.bf16.mxu1 %v2374_v8 }
 0x7fd   :  { %1970 = vmatpush3.bf16.msra.mxu1 %v2384_v13 }
 0x8b3   :  { %v671_v30 = vpop.f32.mrb[2].mxu1 }
 0x8b4   :  { %v672_v35 = vadd.f32 %v671_v30, %v2408_v24  ;;  %v673_v36 = vpop.f32.mrb[3].mxu1 }
 0x8b5   :  { %v674_v39 = vadd.f32 %v673_v36, %v2417_v31  ;;  %v2577_v31 = vrot.slane %v2529_v7, %v2393_v19 }
 0x8b6   :  { %v2557_v45 = vrot.slane %v672_v35, %v2393_v19 }
 0x8b7   :  { %v2562_v51 = vrot.slane %v674_v39, %v2393_v19 }
 0x8b8   :  { %v692_v57 = vadd.f32 %v2557_v45, %v682_v48 }
 0x8b9   :  { %v693_v60 = vadd.f32 %v2562_v51, %v683_v54 }
 0x8bb   :  { %2063 = vtanh.f32 %v693_v60 }
 0x8bc   :  { %2065 = vtanh.f32 %v692_v57 }
 0x8c5   :  { %v2568_v1 = vpop.eup %2063 }
 0x8c6   :  { %v2570_v5 = vpop.eup %2065  ;;  %760 = vmatprep.mubr.f32.mxu1 %v2568_v1 }
 0x8c7   :  { %761 = vmatmul.mubr.f32.vlgmr.msra.gmra.mrb[4].mxu1 %v2570_v5 }
 0x8c8   :  { %1534 = vmatprep.mubr.f32.mxu1 %v2109_v6 }
 0x99a   :  { %v1848_v8 = vpop.f32.mrb[4].mxu1 }
 0x99b   :  { %v1849_v13 = vpop.f32.mrb[5].mxu1 }
 0x99c   :  { %v1850_v24 = vadd.f32 %v1849_v13, %v1848_v8 }
 0x99e   :  { %v770_v40 = vmul.f32 %v1850_v24, %v2577_v31  ;;  %v796_v59 = vmul.f32 %v1850_v24, %v2583_v44 }
 0x9a0   :  { %v771_v46 = vsel %vm107_vm3, %v770_v40, 0.0  ;;  %v797_v11 = vsel %vm107_vm3, %v796_v59, 0.0 }
 0x9a1   :  { %772 = vadd.xlane.f32.xlu0 %v771_v46 }
 0x9a5   :  { %565 = vadd.xlane.f32.xlu0 %v564_v56 }
 0x9a9   :  { %798 = vadd.xlane.f32.xlu0 %v797_v11 }
 0xa2e   :  { %v773_v61 = vpop.xlane.xlu0 %772 }
 0xa2f   :  { %v774_v12 = vsub.f32 0.0, %v773_v61 }
 0xa31   :  { %v775_v62 = vmul.f32 1.442695, %v774_v12 }
 0xa32   :  { %v2599_v35 = vpop.xlane.xlu0 %565 }
 0xa33   :  { %2067 = vpow2.f32 %v775_v62  ;;  %v1047_v39 = vsub.f32 0.0, %v2599_v35 }
 0xa35   :  { %v1048_v57 = vmul.f32 1.442695, %v1047_v39 }
 0xa3d   :  { %v2068_v15 = vpop.eup %2067 }
 0xa3e   :  { %v777_v25 = vadd.f32 1.0, %v2068_v15 }
 0xa40   :  { %2069 = vrcp.f32 %v777_v25 }
 0xa41   :  { %2071 = vpow2.f32 %v1048_v57 }
 0xa4a   :  { %v2591_v9 = vpop.eup %2069 }
 0xa4b   :  { %v779_v10 = vsub.f32 %v2591_v9, %v2515_v34  ;;  %v2072_v11 = vpop.eup %2071 }
 0xa4d   :  { %782 = vperm.xlu1 %2038, %v779_v10  }
 0xa71   :  { %330 = vadd.xlane.f32.xlu1 %v329_v37 }
 0xacc   :  { %v783_v38 = vpop.permute.xlu1 %782 }
 0xacd   :  { %v785_v41 = vmul.f32 %v1850_v24, %v783_v38 }
 0xacf   :  { %v786_v26 = vsel %vm107_vm3, %v785_v41, 0.0 }
 0xad0   :  { %v787_v30 = vrot.slane %v786_v26, 4 }
 0xad2   :  { %v788_v36 = vadd.f32 %v787_v30, %v786_v26 }
 0xad4   :  { %v789_v48 = vrot.slane %v788_v36, 2 }
 0xad6   :  { %v790_v54 = vadd.f32 %v789_v48, %v788_v36  ;;  %v2625_v36 = vpop.xlane.xlu0 %798 }
 0xad7   :  { %v1155_v39 = vsub.f32 0.0, %v2625_v36 }
 0xad8   :  { %v791_v60 = vrot.slane %v790_v54, 1 }
 0xad9   :  { %v1156_v48 = vmul.f32 1.442695, %v1155_v39 }
 0xada   :  { %v792_v8 = vadd.f32 %v791_v60, %v790_v54 }
 0xadc   :  { %v793_v13 = vmul.f32 0.125, %v792_v8 }
 0xade   :  { %v794_v40 = vmul.f32 0.001, %v793_v13 }
 0xae0   :  { %v795_v46 = vsub.f32 %v2529_v7, %v794_v40  ;;  %v1050_v7 = vadd.f32 1.0, %v2072_v11  ;;  %v81_v11 = vld [vmem:[%s2900_s6 + $0x10] sm:$0xff] }
 0xae2   :  { %v2609_v56 = vsub.f32 %v2606_v49, %v795_v46  ;;  %2073 = vrcp.f32 %v1050_v7  ;;  %v80_v46 = vld [vmem:[%s2900_s6 + $0x8] sm:$0xff] }
 0xae3   :  { %v84_v7 = vld [vmem:[%s2900_s6 + $0x28] sm:$0xff] }
 0xae4   :  { %v934_v59 = vmul.f32 0.002, %v2609_v56 }
 0xae6   :  { %v2613_v61 = vrot.slane %v934_v59, %v2393_v19 }
 0xae8   :  { %v2616_v12 = vmul.f32 %v2613_v61, %v783_v38  ;;  %v1160_v62 = vmul.f32 %v1850_v24, %v2613_v61  ;;  %v944_v54 = vmul.f32 %v2448_v58, %v2613_v61  ;;  %v1052_v60 = vmul.f32 %v2503_v21, %v2613_v61  ;;  %v82_v58 = vld [vmem:[%s2900_s6 + $0x18] sm:$0xff]  ;;  %v79_v21 = vld [vmem:[%s2900_s6] sm:$0xff] }
 0xae9   :  { %v1971_v59 = vpack.c.bf16 %v82_v58, %v80_v46 }
 0xaea   :  { %v1161_v15 = vsel %vm107_vm3, %v1160_v62, 0.0  ;;  %v945_v57 = vsel %vm107_vm3, %v944_v54, 0.0  ;;  %v1053_v8 = vsel %vm107_vm3, %v1052_v60, 0.0  ;;  %v2646_v62 = vpack.c.bf16 %v81_v11, %v79_v21 }
 0xaeb   :  { %1162 = vadd.xlane.f32.xlu1 %v1161_v15  ;;  %1972 = vmatprep.subr.bf16.mxu0 %v1971_v59  ;;  %v86_v15 = vld [vmem:[%s2900_s6 + $0x38] sm:$0xff]  ;;  %v958_v60 = vsub.f32 1.0, %v2453_v63  ;;  %v1066_v11 = vsub.f32 1.0, %v2519_v0 }
 0xaec   :  { %v2074_v25 = vpop.eup %2073  ;;  %1974 = vmatpush1.bf16.msra.mxu0 %v2646_v62 }
 0xaed   :  { %v1056_v10 = vsub.f32 %v2074_v25, %v2226_v18  ;;  %v1975_v25 = vpack.c.bf16 %v86_v15, %v84_v7 }
 0xaef   :  { %1976 = vmatprep.subr.bf16.mxu0 %v1975_v25 }
 0xafc   :  { %1059 = vperm.xlu1 %2038, %v1056_v10   ;;  %v83_v10 = vld [vmem:[%s2900_s6 + $0x20] sm:$0xff] }
 0xafe   :  { %v2621_v29 = vpop.xlane.xlu1 %330 }
 0xaff   :  { %v935_v37 = vsub.f32 0.0, %v2621_v29 }
 0xb01   :  { %v936_v41 = vmul.f32 1.442695, %v935_v37  ;;  %v85_v37 = vld [vmem:[%s2900_s6 + $0x30] sm:$0xff] }
 0xb03   :  { %2075 = vpow2.f32 %v936_v41  ;;  %v1977_v41 = vpack.c.bf16 %v85_v37, %v83_v10 }
 0xb05   :  { %1978 = vmatpush1.bf16.msra.mxu0 %v1977_v41 }
 0xb06   :  { %1980 = vmatprep.subr.bf16.mxu0 %v1971_v59 }
 0xb0d   :  { %v2076_v26 = vpop.eup %2075 }
 0xb0e   :  { %v938_v38 = vadd.f32 1.0, %v2076_v26 }
 0xb10   :  { %2077 = vrcp.f32 %v938_v38  ;;  %v2664_v38 = vld [vmem:[%s2896_s1 + $0x18] sm:$0xff] }
 0xb11   :  { %2079 = vpow2.f32 %v1156_v48  ;;  %vm842_vm8 = vcmp.gt.f32.partialorder %v2664_v38, 0.5  ;;  %1264 = vrot.lane.b32.xlu1 %v2664_v38, %s2112_s19 }
 0xb1a   :  { %v2078_v30 = vpop.eup %2077 }
 0xb1b   :  { %v948_v24 = vsub.f32 %v2078_v30, %v2221_v17  ;;  %v2080_v13 = vpop.eup %2079 }
 0xb1c   :  { %v1158_v40 = vadd.f32 1.0, %v2080_v13  ;;  %v955_v13 = vmul.f32 %v2613_v61, %v2457_v3 }
 0xb1d   :  { %951 = vperm.xlu0 %2037, %v948_v24   ;;  %v843_v24 = vsel %vm842_vm8, 1, %v2111_v23 }
 0xb1e   :  { %2081 = vrcp.f32 %v1158_v40 }
 0xb28   :  { %v2082_v26 = vpop.eup %2081 }
 0xb29   :  { %v1164_v30 = vsub.f32 %v2082_v26, %v2515_v34 }
 0xb3c   :  { %946 = vadd.xlane.f32.xlu0 %v945_v57 }
 0xb40   :  { %1054 = vadd.xlane.f32.xlu0 %v1053_v8 }
 0xb56   :  { %1167 = vperm.xlu0 %2037, %v1164_v30  }
 0xb5a   :  { %845 = vperm.xlu0 %2037, %v843_v24  }
 0xb78   :  { %v1163_v48 = vpop.xlane.xlu1 %1162 }
 0xb79   :  { %v1173_v30 = vmul.f32 %v2591_v9, %v1163_v48 }
 0xb7c   :  { %v1060_v46 = vpop.permute.xlu1 %1059 }
 0xb7d   :  { %v1062_v15 = vmul.f32 %v2583_v44, %v1060_v46 }
 0xb9c   :  { %v952_v39 = vpop.permute.xlu0 %951 }
 0xb9d   :  { %v954_v57 = vmul.f32 %v2583_v44, %v952_v39 }
 0xb9f   :  { %v956_v58 = vadd.f32 %v955_v13, %v954_v57 }
 0xbc9   :  { %v947_v54 = vpop.xlane.xlu0 %946 }
 0xbca   :  { %v957_v8 = vmul.f32 %v2453_v63, %v947_v54  ;;  %v1063_v63 = vmul.f32 %v2613_v61, %v2523_v53 }
 0xbcc   :  { %v959_v40 = vmul.f32 %v958_v60, %v957_v8  ;;  %v1064_v24 = vadd.f32 %v1063_v63, %v1062_v15  ;;  %v1037_v15 = vmul.f32 %v2435_v52, %v2435_v52 }
 0xbcd   :  { %v1055_v23 = vpop.xlane.xlu0 %1054 }
 0xbce   :  { %v960_v21 = vmul.f32 %v959_v40, %v2446_v55  ;;  %v1065_v7 = vmul.f32 %v2519_v0, %v1055_v23  ;;  %v1174_v0 = vsub.f32 1.0, %v2591_v9 }
 0xbd0   :  { %v961_v10 = vadd.f32 %v960_v21, %v956_v58  ;;  %v1067_v37 = vmul.f32 %v1066_v11, %v1065_v7  ;;  %v1175_v53 = vmul.f32 %v1174_v0, %v1173_v30  ;;  %v1265_v58 = vpop.permute.xlu1 %1264  ;;  %v1146_v0 = vmul.f32 %v2496_v2, %v2496_v2 }
 0xbd2   :  { %v962_v26 = vmul.f32 0.125, %v961_v10  ;;  %v1068_v3 = vmul.f32 %v1067_v37, %v2507_v22  ;;  %v1176_v9 = vmul.f32 %v1175_v53, %v2577_v31  ;;  %v1038_v10 = vmul.f32 %v2433_v50, %v2433_v50 }
 0xbd3   :  { %v1039_v37 = vsub.f32 1.0, %v1037_v15  ;;  %v1148_v53 = vsub.f32 1.0, %v1146_v0  ;;  %v1253_v50 = vmul.f32 %v2570_v5, %v2570_v5  ;;  %v570_v0 = vand.u32 2147483647, %v2599_v35 }
 0xbd4   :  { %1733 = vmatmul.mubr.msk.f32.vlgmr.msra.gmra.mrb[6].mxu0 %vm107_vm3, %v962_v26  ;;  %v1069_v39 = vadd.f32 %v1068_v3, %v1064_v24  ;;  %v1040_v26 = vsub.f32 1.0, %v1038_v10  ;;  %v800_v10 = vmax.f32 %v2625_v36, 0.0 }
 0xbd5   :  { %1982 = vmatpush1.bf16.msra.mxu0 %v2646_v62  ;;  %v1168_v55 = vpop.permute.xlu0 %1167  ;;  %1138 = vmatprep.mubr.f32.mxu0 %v2109_v6  ;;  %v1255_v2 = vsub.f32 1.0, %v1253_v50 }
 0xbd6   :  { %v1170_v54 = vmul.f32 %v2583_v44, %v1168_v55  ;;  %1984 = vmatprep.subr.bf16.mxu0 %v1975_v25  ;;  %v1070_v22 = vmul.f32 0.125, %v1069_v39  ;;  %v1145_v55 = vmul.f32 %v2498_v4, %v2498_v4 }
 0xbd8   :  { %v1172_v48 = vadd.f32 %v2616_v12, %v1170_v54  ;;  %v1147_v39 = vsub.f32 1.0, %v1145_v55 }
 0xbd9   :  { %1986 = vmatpush1.bf16.msra.mxu0 %v1977_v41  ;;  %v846_v61 = vpop.permute.xlu0 %845 }
 0xbda   :  { %vm847_vm9 = vcmp.eq.s32.totalorder %v846_v61, 1  ;;  %1988 = vmatprep.subr.bf16.mxu0 %v1971_v59  ;;  %v1177_v12 = vadd.f32 %v1176_v9, %v1172_v48 }
 0xbdb   :  { %v848_v57 = vsel %vm847_vm9, %v2411_v27, %v2414_v28  ;;  %v849_v60 = vsel %vm847_vm9, %v2420_v32, %v2423_v33  ;;  %v87_v28 = vld [vmem:[%s2901_s7] sm:$0x3] }
 0xbdc   :  { %v850_v8 = vadd.f32 %v848_v57, %v2557_v45  ;;  %v851_v44 = vadd.f32 %v849_v60, %v2562_v51  ;;  %1734 = vmatmul.mubr.msk.f32.vlgmr.msra.gmra.mrb[8].mxu0 %vm107_vm3, %v1070_v22  ;;  %v1178_v27 = vmul.f32 0.125, %v1177_v12  ;;  %v2705_v32 = vrot.slane %v87_v28, %v2393_v19 }
 0xbdd   :  { %1990 = vmatpush1.bf16.msra.mxu0 %v2646_v62  ;;  %1246 = vmatprep.mubr.f32.mxu0 %v2109_v6  ;;  %v2709_v33 = vrot.slane %v87_v28, %v2396_v20  ;;  %v2113_v62 = vmov 2   ;;  %v1254_v60 = vmul.f32 %v2568_v1, %v2568_v1  ;;  %v1046_v12 = vrot.slane %v2289_v42, %v2393_v19 }
 0xbde   :  { %2083 = vtanh.f32 %v850_v8  ;;  %1992 = vmatprep.subr.bf16.mxu0 %v1975_v25  ;;  %2039 = vset.pattern.permute.xlu1 %v2113_v62  ;;  %v1154_v1 = vrot.slane %v2469_v47, %v2393_v19  ;;  %v335_v28 = vand.u32 2147483647, %v2621_v29 }
 0xbdf   :  { %2085 = vtanh.f32 %v851_v44  ;;  %v1256_v9 = vsub.f32 1.0, %v1254_v60 }
 0xbe1   :  { %1994 = vmatpush1.bf16.msra.mxu0 %v1977_v41 }
 0xbe4   :  { %1735 = vmatmul.mubr.msk.f32.vlgmr.msra.gmra.mrb[10].mxu0 %vm107_vm3, %v1178_v27  ;;  %v1262_v27 = vrot.slane %v2535_v43, %v2393_v19 }
 0xbe5   :  { %1394 = vmatprep.mubr.f32.mxu0 %v2109_v6 }
 0xbe8   :  { %v2711_v45 = vpop.eup %2083 }
 0xbe9   :  { %v2713_v51 = vpop.eup %2085  ;;  %854 = vst [vmem:[%s2902_s9] sm:$0xff] %v2711_v45  ;;  %v867_v31 = vmul.f32 %v2711_v45, %v2705_v32 }
 0xbea   :  { %855 = vst [vmem:[%s2902_s9 + $0x8] sm:$0xff] %v2713_v51  ;;  %v868_v20 = vmul.f32 %v2713_v51, %v2709_v33 }
 0xbec   :  { %v869_v59 = vadd.f32 %v868_v20, %v867_v31  ;;  %v803_v31 = vand.u32 2147483647, %v2625_v36  ;;  %v336_v20 = vsub.f32 0.0, %v335_v28 }
 0xbee   :  { %870 = vadd.xlane.f32.xlu0 %v869_v59  ;;  %v804_v59 = vsub.f32 0.0, %v803_v31 }
 0xbf0   :  { %v805_v42 = vmul.f32 1.442695, %v804_v59 }
 0xc7b   :  { %v871_v25 = vpop.xlane.xlu0 %870 }
 0xc7c   :  { %v2729_v41 = vadd.f32 %v871_v25, %v2664_v38  ;;  %v337_v25 = vmul.f32 1.442695, %v336_v20 }
 0xc7e   :  { %v873_v13 = vsub.f32 0.0, %v2729_v41  ;;  %880 = vrot.lane.b32.xlu1 %v2729_v41, %s2114_s22 }
 0xc80   :  { %v874_v40 = vmul.f32 1.442695, %v873_v13 }
 0xc82   :  { %2087 = vpow2.f32 %v874_v40 }
 0xc8c   :  { %v2088_v46 = vpop.eup %2087 }
 0xc8d   :  { %v876_v23 = vadd.f32 1.0, %v2088_v46 }
 0xc8f   :  { %2089 = vrcp.f32 %v876_v23 }
 0xc90   :  { %2091 = vpow2.f32 %v337_v25 }
 0xc91   :  { %2093 = vpow2.f32 %v805_v42  ;;  %v878_v42 = vmax.f32 %v2729_v41, 0.0 }
 0xc99   :  { %v2733_v21 = vpop.eup %2089 }
 0xc9a   :  { %v1267_v11 = vsub.f32 %v2733_v21, %v1265_v58  ;;  %v2092_v47 = vpop.eup %2091  ;;  %v2107_v58 = vld [vmem:[%s2896_s1] sm:$0xff] }
 0xc9b   :  { %v339_v43 = vadd.f32 1.0, %v2092_v47  ;;  %v2094_v13 = vpop.eup %2093 }
 0xc9c   :  { %v1268_v7 = vmul.f32 0.125, %v1267_v11  ;;  %v807_v40 = vadd.f32 1.0, %v2094_v13  ;;  %v333_v11 = vmul.f32 %v2107_v58, %v2621_v29  ;;  %v829_v58 = vmul.f32 %v2609_v56, %v2609_v56 }
 0xc9d   :  { %2095 = vlog2.f32 %v339_v43 }
 0xc9e   :  { %1271 = vperm.xlu1 %2039, %v1268_v7   ;;  %2097 = vlog2.f32 %v807_v40 }
 0xca7   :  { %v1032_v63 = vpop.f32.mrb[6].mxu0 }
 0xca8   :  { %v1041_v3 = vmul.f32 %v1039_v37, %v1032_v63  ;;  %v1034_v30 = vpop.f32.mrb[7].mxu0  ;;  %v801_v37 = vmul.f32 %v2625_v36, %v2515_v34  ;;  %v1276_v36 = vmul.f32 %v2711_v45, %v2711_v45 }
 0xca9   :  { %v1042_v24 = vmul.f32 %v1040_v26, %v1034_v30 }
 0xcaf   :  { %v1140_v54 = vpop.f32.mrb[8].mxu0 }
 0xcb0   :  { %v1149_v61 = vmul.f32 %v1147_v39, %v1140_v54  ;;  %v1142_v52 = vpop.f32.mrb[9].mxu0  ;;  %v1277_v54 = vmul.f32 %v2713_v51, %v2713_v51 }
 0xcb1   :  { %v1150_v22 = vmul.f32 %v1148_v53, %v1142_v52  ;;  %v1278_v52 = vsub.f32 1.0, %v1276_v36 }
 0xcb2   :  { %v2744_v48 = vpack.c.bf16 %v1149_v61, %v1041_v3  ;;  %v802_v3 = vsub.f32 %v800_v10, %v801_v37 }
 0xcb3   :  { %v2748_v57 = vpack.c.bf16 %v1150_v22, %v1042_v24  ;;  %v1422_v24 = vrot.slane %v2606_v49, %v2393_v19  ;;  %v1279_v19 = vsub.f32 1.0, %v1277_v54 }
 0xcb5   :  { %1996 = vmatprep.subr.bf16.mxu0 %v2748_v57  ;;  %2004 = vmatprep.subr.bf16.mxu1 %v2748_v57  ;;  %v1424_v55 = vsub.f32 %v1154_v1, %v1422_v24  ;;  %v1425_v39 = vsub.f32 %v1262_v27, %v1422_v24 }
 0xcb6   :  { %1998 = vmatpush1.bf16.msra.mxu0 %v2744_v48  ;;  %2006 = vmatpush1.bf16.msra.mxu1 %v2744_v48 }
 0xcb7   :  { %v1248_v4 = vpop.f32.mrb[10].mxu0 }
 0xcb8   :  { %v2756_v8 = vmul.f32 %v1255_v2, %v1248_v4  ;;  %v1250_v44 = vpop.f32.mrb[11].mxu0 }
 0xcb9   :  { %v2758_v5 = vmul.f32 %v1256_v9, %v1250_v44 }
 0xcc7   :  { %1286 = vxpose.xlu1.b32.start [1/4] (short) (narrow) %v1046_v12, 32 }
 0xccb   :  { %1287 = vxpose.xlu1.b32.cont [2/4] (short) (narrow) %v1154_v1, 32 }
 0xccf   :  { %1288 = vxpose.xlu1.b32.cont [3/4] (short) (narrow) %v1262_v27, 32 }
 0xcd3   :  { %1289 = vxpose.xlu1.b32.end [4/4] (short) (narrow) %v1262_v27, 32 }
 0xcd7   :  { %1559 = vxpose.xlu1.b32.start [1/4] (short) (narrow) %v2221_v17, 8  ;;  %v2096_v17 = vpop.eup %2095 }
 0xcd8   :  { %v341_v7 = vmul.f32 0.6931472, %v2096_v17  ;;  %v2098_v15 = vpop.eup %2097 }
 0xcd9   :  { %v809_v26 = vmul.f32 0.6931472, %v2098_v15 }
 0xcdb   :  { %1560 = vxpose.xlu1.b32.cont [2/4] (short) (narrow) %v2226_v18, 8  ;;  %v332_v18 = vmax.f32 %v2621_v29, 0.0  ;;  %v810_v30 = vadd.f32 %v809_v26, %v802_v3  ;;  %v1423_v29 = vsub.f32 %v1046_v12, %v1422_v24 }
 0xcdf   :  { %1561 = vxpose.xlu1.b32.cont [3/4] (short) (narrow) %v2515_v34, 8  ;;  %v571_v34 = vsub.f32 0.0, %v570_v0 }
 0xce1   :  { %v572_v53 = vmul.f32 1.442695, %v571_v34 }
 0xce3   :  { %1562 = vxpose.xlu1.b32.end [4/4] (short) (narrow) %v2664_v38, 8  ;;  %2099 = vpow2.f32 %v572_v53 }
 0xced   :  { %v2100_v45 = vpop.eup %2099 }
 0xcee   :  { %v574_v51 = vadd.f32 1.0, %v2100_v45 }
 0xcf0   :  { %v881_v46 = vpop.permute.xlu1 %880  ;;  %2101 = vlog2.f32 %v574_v51 }
 0xcf1   :  { %v883_v23 = vmul.f32 %v881_v46, %v2664_v38  ;;  %v334_v38 = vsub.f32 %v332_v18, %v333_v11 }
 0xcf3   :  { %885 = vrot.lane.b32.xlu0 %v883_v23, %s2112_s19  ;;  %v342_v63 = vadd.f32 %v341_v7, %v334_v38 }
 0xcfa   :  { %v2102_v9 = vpop.eup %2101 }
 0xcfb   :  { %v576_v12 = vmul.f32 0.6931472, %v2102_v9 }
 0xd01   :  { %344 = vrot.lane.b32.xlu1 %v342_v63, %s2112_s19 }
 0xd05   :  { %812 = vrot.lane.b32.xlu1 %v810_v30, %s2112_s19 }
 0xd11   :  { %1426 = vxpose.xlu0.b32.start [1/4] (short) (narrow) %v1423_v29, 32 }
 0xd15   :  { %1427 = vxpose.xlu0.b32.cont [2/4] (short) (narrow) %v1424_v55, 32 }
 0xd19   :  { %1428 = vxpose.xlu0.b32.cont [3/4] (short) (narrow) %v1425_v39, 32 }
 0xd1d   :  { %1429 = vxpose.xlu0.b32.end [4/4] (short) (narrow) %v1425_v39, 32  ;;  %v1272_v61 = vpop.permute.xlu1 %1271 }
 0xd1e   :  { %v1274_v49 = vmul.f32 %v1272_v61, %v2705_v32  ;;  %v1275_v22 = vmul.f32 %v1272_v61, %v2709_v33  ;;  %v889_v32 = vand.u32 2147483647, %v2729_v41  ;;  %v567_v33 = vmax.f32 %v2599_v35, 0.0 }
 0xd1f   :  { %v830_v41 = vsel %vm89_vm0, %v829_v58, 0.0  ;;  %v2116_v61 = vmov 1966171168  }
 0xd20   :  { %v1280_v50 = vmul.f32 %v1278_v52, %v1274_v49  ;;  %v1281_v60 = vmul.f32 %v1279_v19, %v1275_v22  ;;  %v1695_v52 = vunpack.c.l.s4 %v2116_v61 }
 0xd22   :  { %v2001_v2 = vpack.c.bf16 %v1280_v50, %v2756_v8  ;;  %v1999_v4 = vpack.c.bf16 %v1281_v60, %v2758_v5  ;;  %v2108_v8 = vld [vmem:[%s2896_s1 + $0x8] sm:$0xff]  ;;  %v890_v5 = vsub.f32 0.0, %v889_v32  ;;  %s2115_s1 = smov 126   ;;  %v1696_v22 = vunpack.c.0.s8 %v1695_v52 }
 0xd23   :  { %v568_v44 = vmul.f32 %v2108_v8, %v2599_v35 }
 0xd24   :  { %2000 = vmatprep.subr.bf16.mxu0 %v1999_v4  ;;  %2008 = vmatprep.subr.bf16.mxu1 %v1999_v4  ;;  %v891_v27 = vmul.f32 1.442695, %v890_v5  ;;  %v1699_v51 = vsub.s32 %v1696_v22, %v2390_v16 }
 0xd25   :  { %2002 = vmatpush1.bf16.msra.mxu0 %v2001_v2  ;;  %2010 = vmatpush1.bf16.msra.mxu1 %v2001_v2  ;;  %v569_v1 = vsub.f32 %v567_v33, %v568_v44 }
 0xd26   :  { %2012 = vmatprep.subr.bf16.mxu0 %v2748_v57  ;;  %2103 = vpow2.f32 %v891_v27 }
 0xd27   :  { %v577_v28 = vadd.f32 %v576_v12, %v569_v1 }
 0xd46   :  { %579 = vrot.lane.b32.xlu0 %v577_v28, %s2112_s19 }
 0xd47   :  { %v1302_v57 = vpop.trf.xlu1  ;;  %2040 = vset.pattern.permute.xlu0 %v2113_v62  ;;  %v2104_v62 = vpop.eup %2103 }
 0xd48   :  { %1736 = vmatmul.mubr.msk.f32.vlgmr.msra.gmra.mrb[12].mxu0 %vm107_vm3, %v1302_v57  ;;  %v893_v59 = vadd.f32 1.0, %v2104_v62 }
 0xd49   :  { %2014 = vmatpush1.bf16.msra.mxu0 %v2744_v48  ;;  %1400 = vmatprep.mubr.f32.mxu0 %v2109_v6 }
 0xd4a   :  { %2016 = vmatprep.subr.bf16.mxu0 %v1999_v4  ;;  %2105 = vlog2.f32 %v893_v59 }
 0xd4b   :  { %v1303_v31 = vpop.trf.xlu1 }
 0xd4c   :  { %1737 = vmatmul.mubr.msk.f32.gmra.mrb[14].mxu0 %vm107_vm3, %v1303_v31 }
 0xd4d   :  { %2018 = vmatpush1.bf16.msra.mxu0 %v2001_v2  ;;  %1406 = vmatprep.mubr.f32.mxu0 %v2109_v6 }
 0xd4f   :  { %v1304_v35 = vpop.trf.xlu1 }
 0xd50   :  { %1738 = vmatmul.mubr.msk.f32.gmra.mrb[16].mxu0 %vm107_vm3, %v1304_v35 }
 0xd51   :  { %1412 = vmatprep.mubr.f32.mxu0 %v2109_v6 }
 0xd53   :  { %v1305_v20 = vpop.trf.xlu1 }
 0xd54   :  { %1739 = vmatmul.mubr.msk.f32.gmra.mrb[18].mxu0 %vm107_vm3, %v1305_v20  ;;  %v2106_v25 = vpop.eup %2105 }
 0xd55   :  { %1658 = vmatprep.mubr.f32.mxu0 %v2109_v6  ;;  %v895_v13 = vmul.f32 0.6931472, %v2106_v25 }
 0xd57   :  { %v1575_v48 = vpop.trf.xlu1 }
 0xd58   :  { %1744 = vmatmul.mubr.msk.f32.vlgmr.msra.gmra.mrb[20].mxu0 %vm107_vm3, %v1575_v48 }
 0xd65   :  { %v886_v47 = vpop.permute.xlu0 %885 }
 0xd66   :  { %v888_v43 = vsub.f32 %v878_v42, %v886_v47 }
 0xd68   :  { %v896_v40 = vadd.f32 %v895_v13, %v888_v43 }
 0xd6a   :  { %898 = vrot.lane.b32.xlu1 %v896_v40, %s2115_s1 }
 0xd73   :  { %v345_v46 = vpop.permute.xlu1 %344 }
 0xd74   :  { %v348_v23 = vsel %vm347_vm10, %v345_v46, 0.0 }
 0xd77   :  { %v813_v17 = vpop.permute.xlu1 %812 }
 0xd78   :  { %v815_v18 = vsel %vm347_vm10, %v813_v17, 0.0 }
 0xd8e   :  { %349 = vadd.xlane.f32.xlu1 %v348_v23 }
 0xd91   :  { %v1442_v11 = vpop.trf.xlu0 }
 0xd92   :  { %816 = vadd.xlane.f32.xlu1 %v815_v18  ;;  %1740 = vmatmul.mubr.msk.f32.vlgmr.msra.gmra.mrb[6].mxu1 %vm107_vm3, %v1442_v11 }
 0xd93   :  { %1540 = vmatprep.mubr.f32.mxu1 %v2109_v6 }
 0xd95   :  { %v1443_v7 = vpop.trf.xlu0 }
 0xd96   :  { %831 = vadd.xlane.f32.xlu1 %v830_v41  ;;  %1741 = vmatmul.mubr.msk.f32.gmra.mrb[8].mxu1 %vm107_vm3, %v1443_v7 }
 0xd97   :  { %1546 = vmatprep.mubr.f32.mxu1 %v2109_v6 }
 0xd99   :  { %v1444_v15 = vpop.trf.xlu0 }
 0xd9a   :  { %1742 = vmatmul.mubr.msk.f32.gmra.mrb[10].mxu1 %vm107_vm3, %v1444_v15 }
 0xd9b   :  { %1552 = vmatprep.mubr.f32.mxu1 %v2109_v6 }
 0xd9d   :  { %v1445_v56 = vpop.trf.xlu0 }
 0xd9e   :  { %1743 = vmatmul.mubr.msk.f32.gmra.mrb[12].mxu1 %vm107_vm3, %v1445_v56 }
 0xdb8   :  { %v580_v10 = vpop.permute.xlu0 %579 }
 0xdb9   :  { %v582_v37 = vsel %vm347_vm10, %v580_v10, 0.0 }
 0xdba   :  { %583 = vadd.xlane.f32.xlu0 %v582_v37 }
 0xdd0   :  { %929 = vperm.xlu0 %2040, %v2733_v21  }
 0xddc   :  { %v899_v38 = vpop.permute.xlu1 %898 }
 0xddd   :  { %v901_v63 = vsel %vm347_vm10, %v899_v38, 0.0 }
 0xdde   :  { %902 = vadd.xlane.f32.xlu1 %v901_v63 }
 0xe1b   :  { %v350_v26 = vpop.xlane.xlu1 %349  ;;  %v1396_v3 = vpop.f32.mrb[12].mxu0 }
 0xe1c   :  { %v351_v30 = vrot.slane %v350_v26, 4  ;;  %1673 = vst [vmem:[%s2903_s8] sm:$0xff] %v1396_v3  ;;  %v1398_v6 = vpop.f32.mrb[13].mxu0 }
 0xe1d   :  { %1674 = vst [vmem:[%s2903_s8 + $0x8] sm:$0xff] %v1398_v6 }
 0xe1e   :  { %v352_v24 = vadd.f32 %v351_v30, %v350_v26 }
 0xe1f   :  { %v1402_v29 = vpop.f32.mrb[14].mxu0  ;;  %v817_v8 = vpop.xlane.xlu1 %816 }
 0xe20   :  { %v353_v55 = vrot.slane %v352_v24, 2  ;;  %1675 = vst [vmem:[%s2903_s8 + $0x10] sm:$0xff] %v1402_v29  ;;  %v1404_v21 = vpop.f32.mrb[15].mxu0  ;;  %v818_v5 = vrot.slane %v817_v8, 4 }
 0xe21   :  { %1676 = vst [vmem:[%s2903_s8 + $0x18] sm:$0xff] %v1404_v21 }
 0xe22   :  { %v354_v0 = vadd.f32 %v353_v55, %v352_v24  ;;  %v819_v1 = vadd.f32 %v818_v5, %v817_v8 }
 0xe23   :  { %v1408_v39 = vpop.f32.mrb[16].mxu0  ;;  %v832_v44 = vpop.xlane.xlu1 %831 }
 0xe24   :  { %v355_v34 = vrot.slane %v354_v0, 1  ;;  %1677 = vst [vmem:[%s2903_s8 + $0x20] sm:$0xff] %v1408_v39  ;;  %v1410_v36 = vpop.f32.mrb[17].mxu0  ;;  %v833_v12 = vrot.slane %v832_v44, 4  ;;  %v820_v28 = vrot.slane %v819_v1, 2 }
 0xe25   :  { %1678 = vst [vmem:[%s2903_s8 + $0x28] sm:$0xff] %v1410_v36 }
 0xe26   :  { %v356_v54 = vadd.f32 %v355_v34, %v354_v0  ;;  %v834_v27 = vadd.f32 %v833_v12, %v832_v44  ;;  %v821_v20 = vadd.f32 %v820_v28, %v819_v1  ;;  %v916_v0 = vand.u32 127, %v97_v14 }
 0xe27   :  { %v1414_v53 = vpop.f32.mrb[18].mxu0 }
 0xe28   :  { %2019 = vpush %v356_v54  ;;  %1679 = vst [vmem:[%s2903_s8 + $0x30] sm:$0xff] %v1414_v53  ;;  %v1416_v19 = vpop.f32.mrb[19].mxu0  ;;  %v835_v31 = vrot.slane %v834_v27, 2  ;;  %v822_v42 = vrot.slane %v821_v20, 1  ;;  %vm923_vm13 = vcmp.eq.s32.totalorder %v916_v0, 2  ;;  %vm920_vm14 = vcmp.eq.s32.totalorder %v916_v0, 1 }
 0xe29   :  { %1680 = vst [vmem:[%s2903_s8 + $0x38] sm:$0xff] %v1416_v19  ;;  %vm924_vm15 = vmand %vm923_vm13, %vm921_vm12  ;;  %vm919_vm1 = vcmp.eq.s32.totalorder %v916_v0, 0 }
 0xe2a   :  { %v836_v48 = vadd.f32 %v835_v31, %v834_v27  ;;  %v823_v40 = vadd.f32 %v822_v42, %v821_v20  ;;  %vm922_vm0 = vmand %vm920_vm14, %vm921_vm12 }
 0xe2b   :  { %v1660_v49 = vpop.f32.mrb[20].mxu0 }
 0xe2c   :  { %v1667_v50 = vrot.slane %v1660_v49, 1  ;;  %1689 = vst [vmem:[%s2903_s8 + $0x80] sm:$0x3] %v1660_v49  ;;  %v1662_v60 = vpop.f32.mrb[21].mxu0  ;;  %v837_v43 = vrot.slane %v836_v48, 1 }
 0xe2d   :  { %v1668_v2 = vrot.slane %v1662_v60, 1  ;;  %1690 = vst [vmem:[%s2903_s8 + $0x88] sm:$0x3] %v1662_v60 }
 0xe2e   :  { %v1671_v4 = vadd.f32 %v1667_v50, %v1660_v49  ;;  %v838_v46 = vadd.f32 %v837_v43, %v836_v48 }
 0xe2f   :  { %v1672_v45 = vadd.f32 %v1668_v2, %v1662_v60 }
 0xe31   :  { %v1693_v32 = vcombine.low %v1671_v4, %v1672_v45 }
 0xe33   :  { %v1700_v9 = vrot.slane %v1693_v32, %v1699_v51 }
 0xe35   :  { %v1707_v33 = vrot.slane %v1700_v9, %v1699_v51 }
 0xe37   :  { %1745 = vst.msk [vmem:[%s2903_s8 + $0x82] ss:$8 sm:$0x3] %vm1711_vm11, %v1707_v33 }
 0xe47   :  { %v584_v57 = vpop.xlane.xlu0 %583 }
 0xe48   :  { %v585_v35 = vrot.slane %v584_v57, 4 }
 0xe4a   :  { %v586_v62 = vadd.f32 %v585_v35, %v584_v57 }
 0xe4c   :  { %v587_v59 = vrot.slane %v586_v62, 2 }
 0xe4e   :  { %v588_v25 = vadd.f32 %v587_v59, %v586_v62 }
 0xe4f   :  { %v930_v49 = vpop.permute.xlu0 %929 }
 0xe50   :  { %v589_v47 = vrot.slane %v588_v25, 1 }
 0xe52   :  { %v590_v13 = vadd.f32 %v589_v47, %v588_v25 }
 0xe54   :  { %2021 = vpush %v590_v13 }
 0xe55   :  { %2023 = vpush %v823_v40 }
 0xe56   :  { %2025 = vpush %v838_v46 }
 0xe59   :  { %s2020_s13 = spop %2019 }
 0xe5a   :  { %v358_v6 = vstv %s2020_s13 }
 0xe5b   :  { %v360_v29 = vmul.f32 0.125, %v358_v6 }
 0xe65   :  { %v1536_v23 = vpop.f32.mrb[6].mxu1 }
 0xe66   :  { %1681 = vst [vmem:[%s2903_s8 + $0x40] sm:$0xff] %v1536_v23  ;;  %v1538_v17 = vpop.f32.mrb[7].mxu1 }
 0xe67   :  { %1682 = vst [vmem:[%s2903_s8 + $0x48] sm:$0xff] %v1538_v17 }
 0xe69   :  { %v1542_v18 = vpop.f32.mrb[8].mxu1 }
 0xe6a   :  { %1683 = vst [vmem:[%s2903_s8 + $0x50] sm:$0xff] %v1542_v18  ;;  %v1544_v58 = vpop.f32.mrb[9].mxu1 }
 0xe6b   :  { %v903_v11 = vpop.xlane.xlu1 %902  ;;  %1684 = vst [vmem:[%s2903_s8 + $0x58] sm:$0xff] %v1544_v58 }
 0xe6c   :  { %v904_v41 = vrot.slane %v903_v11, 4 }
 0xe6d   :  { %v1548_v7 = vpop.f32.mrb[10].mxu1 }
 0xe6e   :  { %v905_v15 = vadd.f32 %v904_v41, %v903_v11  ;;  %1685 = vst [vmem:[%s2903_s8 + $0x60] sm:$0xff] %v1548_v7  ;;  %v1550_v56 = vpop.f32.mrb[11].mxu1 }
 0xe6f   :  { %1686 = vst [vmem:[%s2903_s8 + $0x68] sm:$0xff] %v1550_v56 }
 0xe70   :  { %v906_v10 = vrot.slane %v905_v15, 2 }
 0xe71   :  { %v1554_v37 = vpop.f32.mrb[12].mxu1 }
 0xe72   :  { %v907_v38 = vadd.f32 %v906_v10, %v905_v15  ;;  %1687 = vst [vmem:[%s2903_s8 + $0x70] sm:$0xff] %v1554_v37  ;;  %v1556_v63 = vpop.f32.mrb[13].mxu1 }
 0xe73   :  { %1688 = vst [vmem:[%s2903_s8 + $0x78] sm:$0xff] %v1556_v63 }
 0xe74   :  { %v908_v26 = vrot.slane %v907_v38, 1 }
 0xe76   :  { %v909_v3 = vadd.f32 %v908_v26, %v907_v38 }
 0xe78   :  { %2027 = vpush %v909_v3 }
 0xe85   :  { %s2022_s14 = spop %2021 }
 0xe86   :  { %v592_v30 = vstv %s2022_s14  ;;  %s2024_s5 = spop %2023 }
 0xe87   :  { %v593_v24 = vmul.f32 0.125, %v592_v30  ;;  %v825_v55 = vstv %s2024_s5  ;;  %s2026_s15 = spop %2025 }
 0xe88   :  { %v826_v39 = vmul.f32 0.125, %v825_v55  ;;  %v840_v36 = vstv %s2026_s15 }
 0xe89   :  { %v594_v21 = vadd.f32 %v593_v24, %v360_v29 }
 0xe8b   :  { %v827_v34 = vadd.f32 %v826_v39, %v594_v21 }
 0xe8d   :  { %v913_v53 = vadd.f32 %v840_v36, %v827_v34 }
 0xea9   :  { %s2028_s8 = spop %2027 }
 0xeaa   :  { %v911_v54 = vstv %s2028_s8 }
 0xeab   :  { %v912_v61 = vmul.f32 0.125, %v911_v54 }
 0xead   :  { %v914_v52 = vadd.f32 %v913_v53, %v912_v61  ;;  %v925_v19 = vsel %vm924_vm15, %v912_v61, 0.0 }
 0xeaf   :  { %v926_v22 = vsel %vm922_vm0, %v914_v52, %v925_v19 }
 0xeb0   :  { %v932_v14 = vsel %vm919_vm1, %v930_v49, %v926_v22 }
 0xeb1   :  { %933 = vst [vmem:[%s2904_s10] sm:$0xff] %v932_v14 }

</bundles_post_ra>
